<compile_context>
chip_gen: v7x
topology: tpu7x:2x2x1
jax: 0.10.0
libtpu: 0.0.40
codegen_flags: <defaults>
</compile_context>

<pallas_src>
import jax
import jax.numpy as jnp
import numpy as np
from jax.experimental import pallas as pl
from jax.experimental.pallas import tpu as pltpu


def attention_pallas(decoder_output, encoder_outputs, mask, W, b, v_w, *,
                     logit_clipping=True, clip_value=10.0,
                     use_bf16=True, tb=None, ts=None):
    """Pallas equivalent of Attention.forward.

    decoder_output : (B, dec_dim) f32
    encoder_outputs: (S, B, enc_dim) f32   (native PyTorch layout, read once)
    mask           : (B, S) int (0 => -inf)
    W              : (dec_dim, enc_dim + dec_dim)  nn.Linear weight, cat = [dec, enc]
    b              : (dec_dim,)
    v_w            : (1, dec_dim)                  nn.Linear(dec_dim, 1, bias=False)
    returns        : (B, S) f32 attention logits (masked positions = -inf)
    """
    seq_len, batch, enc_dim = encoder_outputs.shape
    dec_dim = decoder_output.shape[1]
    mm_dtype = jnp.bfloat16 if use_bf16 else jnp.float32

    enc = encoder_outputs.astype(jnp.float32)            # (S, B, E) — no copy if f32
    wenc_t = W[:, dec_dim:].T.astype(mm_dtype)           # (E, D)

    # Hoisted decoder projection: one small (B, D) f32 XLA matmul, per-row bias.
    dec_bias = (decoder_output.astype(jnp.float32)
                @ W[:, :dec_dim].T.astype(jnp.float32)
                + b.astype(jnp.float32)[None, :])        # (B, D)
    dec_bias3 = dec_bias[None, :, :]                     # (1, B, D)
    v3 = v_w.reshape(1, 1, dec_dim).astype(jnp.float32)  # (1, 1, D)
    mask_t = jnp.transpose(mask.astype(jnp.int32))       # (S, B) — tiny copy

    # ---- tile selection ----------------------------------------------------
    # tb is the lane dim of mask/out and the sublane dim of enc/dec_bias blocks:
    #   it must be the full batch or a multiple of 128 (lane rule), and should
    #   be a multiple of 8 so the in-kernel (TS, TB, E)->(TS*TB, E) merge is
    #   layout-free.
    # ts is the sublane dim of mask/out: multiple of 8 or the full seq length.
    if tb is None:
        tb = 128 if (batch > 128 and batch % 128 == 0) else batch
    if ts is None:
        budget = 12 << 20                 # per enc buffer (x2 double-buffered)
        target = max(8, 4096 // max(tb, 1))
        ts = seq_len
        for cand in (512, 256, 128, 64, 32, 16, 8):
            if (seq_len % cand == 0 and cand <= max(target, 8)
                    and cand * tb * enc_dim * 4 <= budget):
                ts = cand
                break
    nb, ns = pl.cdiv(batch, tb), pl.cdiv(seq_len, ts)

    def kernel(enc_ref, db_ref, w_ref, v_ref, mask_ref, out_ref):
        ts_, tb_, e_ = enc_ref.shape
        d_ = w_ref.shape[1]
        enc_blk = enc_ref[...]                                  # (TS, TB, E) f32
        if use_bf16:
            enc_blk = enc_blk.astype(jnp.bfloat16)              # free VPU cast
        # One big MXU matmul per slab: (TS*TB, E) @ (E, D), f32 accumulation.
        proj = jnp.dot(enc_blk.reshape(ts_ * tb_, e_), w_ref[...],
                       preferred_element_type=jnp.float32)
        proj = proj.reshape(ts_, tb_, d_)                       # TB % 8 == 0: free
        # + hoisted decoder projection (broadcast over seq), tanh on the EUP.
        energy = jnp.tanh(proj + db_ref[...])                   # (TS, TB, D) f32
        # v-projection as VPU multiply + XLU lane reduction (not an N=1 matmul).
        scores = jnp.sum(energy * v_ref[...], axis=-1)          # (TS, TB) f32
        if logit_clipping:
            scores = clip_value * jnp.tanh(scores)
        scores = jnp.where(mask_ref[...] == 0, -jnp.inf, scores)
        out_ref[...] = scores.astype(out_ref.dtype)

    cost = pl.CostEstimate(
        flops=2 * batch * seq_len * enc_dim * dec_dim
              + 3 * batch * seq_len * dec_dim,
        transcendentals=batch * seq_len * (dec_dim + 1),
        bytes_accessed=int(enc.size * 4                 # enc read once, f32
                           + mask_t.size * 4
                           + batch * seq_len * 4        # output
                           + dec_bias.size * 4
                           + wenc_t.size * wenc_t.dtype.itemsize
                           + v3.size * 4))

    out_sb = pl.pallas_call(
        kernel,
        out_shape=jax.ShapeDtypeStruct((seq_len, batch), jnp.float32),
        grid_spec=pltpu.PrefetchScalarGridSpec(
            num_scalar_prefetch=0,
            grid=(nb, ns),
            in_specs=[
                pl.BlockSpec((ts, tb, enc_dim), lambda i, j: (j, i, 0)),  # enc slab
                pl.BlockSpec((1, tb, dec_dim), lambda i, j: (0, i, 0)),   # dec_bias
                pl.BlockSpec((enc_dim, dec_dim), lambda i, j: (0, 0)),    # W_enc^T
                pl.BlockSpec((1, 1, dec_dim), lambda i, j: (0, 0, 0)),    # v
                pl.BlockSpec((ts, tb), lambda i, j: (j, i)),              # mask (S,B)
            ],
            out_specs=pl.BlockSpec((ts, tb), lambda i, j: (j, i)),        # (S, B)
        ),
        compiler_params=pltpu.CompilerParams(
            dimension_semantics=("parallel", "parallel")),
        cost_estimate=cost,
    )(enc, dec_bias3, wenc_t, v3, mask_t)

    # Tiny (B*S*4 bytes) final transpose back to the PyTorch (B, S) result.
    return jnp.transpose(out_sb)


def attention_reference(decoder_output, encoder_outputs, mask, W, b, v_w,
                        logit_clipping=True, clip_value=10.0):
    """Plain-JAX mirror of the PyTorch forward (for correctness check)."""
    seq_len = encoder_outputs.shape[0]
    dec_rep = jnp.repeat(decoder_output[:, None, :], seq_len, axis=1)     # (B, S, D)
    enc = jnp.transpose(encoder_outputs, (1, 0, 2))                       # (B, S, E)
    cat = jnp.concatenate([dec_rep, enc], axis=2)                         # (B, S, D+E)
    energy = jnp.tanh(cat @ W.T + b)                                      # (B, S, D)
    attn = (energy @ v_w.T)[..., 0]                                       # (B, S)
    if logit_clipping:
        attn = clip_value * jnp.tanh(attn)
    return jnp.where(mask == 0, -jnp.inf, attn)


if __name__ == "__main__":
    enc_dim, dec_dim = 32, 32
    batch, seq_len = 16, 256          # small, but enough to exercise a 4-step grid

    key = jax.random.PRNGKey(0)
    k1, k2, k3, k4, k5, k6 = jax.random.split(key, 6)

    # Deterministic parameter init (shapes match nn.Linear in __init__).
    W = jax.random.normal(k1, (dec_dim, enc_dim + dec_dim), jnp.float32) * 0.1
    b = jax.random.normal(k2, (dec_dim,), jnp.float32) * 0.1
    v_w = jax.random.normal(k3, (1, dec_dim), jnp.float32) * 0.1

    # Example inputs (PyTorch layout: encoder_outputs is (S, B, E)).
    decoder_output = jax.random.normal(k4, (batch, dec_dim), jnp.float32)
    encoder_outputs = jax.random.normal(k5, (seq_len, batch, enc_dim), jnp.float32)
    lengths = jax.random.randint(k6, (batch,), 1, seq_len + 1)
    mask = (jnp.arange(seq_len)[None, :] < lengths[:, None]).astype(jnp.int32)

    # Default (bf16-fed MXU) path; tiles (TS, TB) = (64, 16) -> grid (1, 4).
    out_bf16 = attention_pallas(decoder_output, encoder_outputs, mask, W, b, v_w,
                                tb=16, ts=64)
    out_bf16 = jax.block_until_ready(out_bf16)

    # Pure-f32 path for a tight structural/numerical check.
    out_f32 = attention_pallas(decoder_output, encoder_outputs, mask, W, b, v_w,
                               tb=16, ts=64, use_bf16=False)
    out_f32 = jax.block_until_ready(out_f32)

    ref = attention_reference(decoder_output, encoder_outputs, mask, W, b, v_w)
    np.testing.assert_allclose(np.asarray(out_f32), np.asarray(ref),
                               rtol=1e-4, atol=1e-4)
    np.testing.assert_allclose(np.asarray(out_bf16), np.asarray(ref),
                               rtol=5e-2, atol=1e-1)

    print("KERNEL_OK")
</pallas_src>

<mosaic_0001>
module attributes {stable_mosaic.version = 11 : i64} {
  func.func @kernel(%arg0: i32, %arg1: i32, %arg2: memref<64x16x32xf32, #tpu.memory_space<vmem>>, %arg3: memref<1x16x32xf32, #tpu.memory_space<vmem>>, %arg4: memref<32x32xbf16, #tpu.memory_space<vmem>>, %arg5: memref<1x1x32xf32, #tpu.memory_space<vmem>>, %arg6: memref<64x16xi32, #tpu.memory_space<vmem>>, %arg7: memref<64x16xf32, #tpu.memory_space<vmem>>) attributes {dimension_semantics = [#tpu.dimension_semantics<parallel>, #tpu.dimension_semantics<parallel>], iteration_bounds = array<i64: 1, 4>, scalar_prefetch = 0 : i64, scratch_operands = 0 : i64, tpu.core_type = #tpu.core_type<tc>, window_params = [{transform_indices = @transform_0, window_bounds = array<i64: 64, 16, 32>}, {transform_indices = @transform_1, window_bounds = array<i64: 1, 16, 32>}, {pipeline_mode = #tpu.pipeline_mode<synchronous>, transform_indices = @transform_2, window_bounds = array<i64: 32, 32>}, {pipeline_mode = #tpu.pipeline_mode<synchronous>, transform_indices = @transform_3, window_bounds = array<i64: 1, 1, 32>}, {transform_indices = @transform_4, window_bounds = array<i64: 64, 16>}, {transform_indices = @transform_5, window_bounds = array<i64: 64, 16>}]} {
    %c0 = arith.constant 0 : index
    %c0_0 = arith.constant 0 : index
    %c0_1 = arith.constant 0 : index
    %0 = vector.load %arg2[%c0, %c0_0, %c0_1] : memref<64x16x32xf32, #tpu.memory_space<vmem>>, vector<64x16x32xf32>
    %1 = arith.truncf %0 : vector<64x16x32xf32> to vector<64x16x32xbf16>
    %2 = vector.shape_cast %1 : vector<64x16x32xbf16> to vector<1024x32xbf16>
    %c0_2 = arith.constant 0 : index
    %c0_3 = arith.constant 0 : index
    %3 = vector.load %arg4[%c0_2, %c0_3] : memref<32x32xbf16, #tpu.memory_space<vmem>>, vector<32x32xbf16>
    %cst = arith.constant dense<0.000000e+00> : vector<1024x32xf32>
    %4 = tpu.matmul %2, %3, %cst {dimension_numbers = #tpu.dot_dimension_numbers<[1], [0], [0], [1], [0, 0, 1, 1], [], []>} : vector<1024x32xbf16>, vector<32x32xbf16>, vector<1024x32xf32> -> vector<1024x32xf32>
    %5 = vector.shape_cast %4 : vector<1024x32xf32> to vector<64x16x32xf32>
    %c0_4 = arith.constant 0 : index
    %c0_5 = arith.constant 0 : index
    %c0_6 = arith.constant 0 : index
    %6 = vector.load %arg3[%c0_4, %c0_5, %c0_6] : memref<1x16x32xf32, #tpu.memory_space<vmem>>, vector<1x16x32xf32>
    %7 = vector.broadcast %6 : vector<1x16x32xf32> to vector<64x16x32xf32>
    %8 = arith.addf %5, %7 : vector<64x16x32xf32>
    %9 = math.tanh %8 : vector<64x16x32xf32>
    %c0_7 = arith.constant 0 : index
    %c0_8 = arith.constant 0 : index
    %c0_9 = arith.constant 0 : index
    %10 = vector.load %arg5[%c0_7, %c0_8, %c0_9] : memref<1x1x32xf32, #tpu.memory_space<vmem>>, vector<1x1x32xf32>
    %11 = vector.broadcast %10 : vector<1x1x32xf32> to vector<64x16x32xf32>
    %12 = arith.mulf %9, %11 : vector<64x16x32xf32>
    %cst_10 = arith.constant dense<0.000000e+00> : vector<64x16xf32>
    %13 = vector.multi_reduction <add>, %12, %cst_10 [2] : vector<64x16x32xf32> to vector<64x16xf32>
    %14 = math.tanh %13 : vector<64x16xf32>
    %cst_11 = arith.constant 1.000000e+01 : f32
    %15 = vector.broadcast %cst_11 : f32 to vector<64x16xf32>
    %16 = arith.mulf %15, %14 : vector<64x16xf32>
    %c0_12 = arith.constant 0 : index
    %c0_13 = arith.constant 0 : index
    %17 = vector.load %arg6[%c0_12, %c0_13] : memref<64x16xi32, #tpu.memory_space<vmem>>, vector<64x16xi32>
    %c0_i32 = arith.constant 0 : i32
    %18 = vector.broadcast %c0_i32 : i32 to vector<64x16xi32>
    %19 = arith.cmpi eq, %17, %18 : vector<64x16xi32>
    %cst_14 = arith.constant 0xFF800000 : f32
    %20 = vector.broadcast %cst_14 : f32 to vector<64x16xf32>
    %21 = arith.select %19, %20, %16 : vector<64x16xi1>, vector<64x16xf32>
    %c0_15 = arith.constant 0 : index
    %c0_16 = arith.constant 0 : index
    %22 = vector.load %arg7[%c0_15, %c0_16] : memref<64x16xf32, #tpu.memory_space<vmem>>, vector<64x16xf32>
    tpu.vector_store %arg7[%c0_15, %c0_16], %21 {strides = array<i32>} : memref<64x16xf32, #tpu.memory_space<vmem>>, vector<64x16xf32>,
    return
  }
  func.func @transform_0(%arg0: i32, %arg1: i32) -> (i32, i32, i32) {
    %c0_i32 = arith.constant 0 : i32
    %c0_i32_0 = arith.constant 0 : i32
    return %arg1, %arg0, %c0_i32 : i32, i32, i32
  }
  func.func @transform_1(%arg0: i32, %arg1: i32) -> (i32, i32, i32) {
    %c0_i32 = arith.constant 0 : i32
    %c0_i32_0 = arith.constant 0 : i32
    %c0_i32_1 = arith.constant 0 : i32
    return %c0_i32, %arg0, %c0_i32_0 : i32, i32, i32
  }
  func.func @transform_2(%arg0: i32, %arg1: i32) -> (i32, i32) {
    %c0_i32 = arith.constant 0 : i32
    %c0_i32_0 = arith.constant 0 : i32
    %c0_i32_1 = arith.constant 0 : i32
    return %c0_i32, %c0_i32_0 : i32, i32
  }
  func.func @transform_3(%arg0: i32, %arg1: i32) -> (i32, i32, i32) {
    %c0_i32 = arith.constant 0 : i32
    %c0_i32_0 = arith.constant 0 : i32
    %c0_i32_1 = arith.constant 0 : i32
    %c0_i32_2 = arith.constant 0 : i32
    return %c0_i32, %c0_i32_0, %c0_i32_1 : i32, i32, i32
  }
  func.func @transform_4(%arg0: i32, %arg1: i32) -> (i32, i32) {
    %c0_i32 = arith.constant 0 : i32
    return %arg1, %arg0 : i32, i32
  }
  func.func @transform_5(%arg0: i32, %arg1: i32) -> (i32, i32) {
    %c0_i32 = arith.constant 0 : i32
    return %arg1, %arg0 : i32, i32
  }
}

</mosaic_0001>

<bundles_post_ra>
// kernel: tpu_custom_call.1
= control target key start
LH: loop header
LB: loop body
LE: loop exit
PB: predicated region body
PF: predicated region fallthrough
CT: control target
= control target key end

     0   :  { %s4108_s18 = smov 0   ;;  %s4110_s19 = smov 0   ;;  %s5694_s0 = inlined_call_operand.vmem [shape: f32[256,16,32], index: 0, kind: input, shape index: {}]   ;;  %s5695_s1 = inlined_call_operand.vmem [shape: f32[1,16,32], index: 1, kind: input, shape index: {}]   ;;  %s5696_s2 = inlined_call_operand.vmem [shape: bf16[32,32], index: 2, kind: input, shape index: {}]   ;;  %s5697_s3 = inlined_call_operand.vmem [shape: f32[1,1,32], index: 3, kind: input, shape index: {}]   ;;  %s5698_s4 = inlined_call_operand.vmem [shape: s32[256,16], index: 4, kind: input, shape index: {}]   ;;  %s5699_s5 = inlined_call_operand.vmem [shape: f32[256,16], index: 5, kind: output, shape index: {}]  }
   0x1   :  { %s4112_s20 = smov 0  }
   0x2 LB: > { %s24_s21 = sadd.s32 1, %s4072_s19  ;;  %p3230_p0 = scmp.ge.s32.totalorder %s4076_s20, 1  ;;  %s4076_s20 = sphi %s4112_s20, %s15_s20   ;;  %s4072_s19 = sphi %s4110_s19, %s5734_s19   ;;  %s4068_s18 = sphi %s4108_s18, %s5733_s18  }
   0x3   : > { %p25_p1 = scmp.ge.s32.totalorder %s24_s21, 4  ;;  %p237_p2 = scmp.lt.s32.totalorder %s4076_s20, 5 }
   0x5   : > { %s5736_s21 = smov (%p25_p1, %s24_s21), 0  ;;  %p238_p3 = pnand %p3230_p0, %p237_p2 }
   0x7   : > { %241 = sbr.rel (%p238_p3) target bundleno = 666 (0x29a), region = 40 }
   0xe   : > { %v3534_v0 = vld [vmem:[%s5696_s2] sm:$0xff]   ;;  %s3231_s24 = sshll.u32 %s4068_s18, 6  ;;  %v3535_v1 = vld [vmem:[%s5696_s2 + $0x8] sm:$0xff]   ;;  %vm531_vm0 = vcmask 261120   ;;  %s3234_s22 = sshll.u32 %s4068_s18, 3  ;;  %vm2457_vm1 = vcmask 130112  }
   0xf   : > { %p288_p4 = scmp.lt.s32.totalorder %s3231_s24, 255  ;;  %3374 = vmatprep.subr.bf16.mxu0 %v3534_v0  ;;  %3506 = vmatprep.subr.bf16.mxu1 %v3534_v0  ;;  %p5186_p5 = scmp.lt.s32.totalorder %s3234_s22, 31  ;;  %vm3026_vm2 = vcmask 1041409   ;;  %vm3028_vm3 = vcmask 1042434   ;;  %vm3030_vm4 = vcmask 1043459   ;;  %vm3032_vm5 = vcmask 1044484  }
  0x10   : > { %3375 = vmatpush3.bf16.msra.mxu0 %v3534_v0  ;;  %3508 = vmatpush3.bf16.msra.mxu1 %v3534_v0  ;;  %vm3034_vm6 = vcmask 1045509   ;;  %vm3036_vm7 = vcmask 1046534   ;;  %vm3038_vm8 = vcmask 1047559   ;;  %vm3105_vm10 = vcmask 130048  }
  0x11   : > { %s5738_s24 = smov (!%p288_p4, %s3231_s24), 255  ;;  %3376 = vmatprep.subr.bf16.mxu0 %v3535_v1  ;;  %3507 = vmatprep.subr.bf16.mxu1 %v3535_v1  ;;  %s5740_s22 = smov (!%p5186_p5, %s3234_s22), 31 }
  0x12   : > { %s3307_s27 = sshll.u32 %s5738_s24, 4  ;;  %s3235_s18 = sshll.u32 %s5740_s22, 3 }
  0x13   : > { %s4138_s30 = scalar_lea.vmem %s5694_s0, %s3307_s27  ;;  %s5257_s26 = scalar_lea.vmem %s5698_s4, %s3235_s18 }
  0x14   : > { %3377 = vmatpush3.bf16.msra.mxu0 %v3535_v1  ;;  %3509 = vmatpush3.bf16.msra.mxu1 %v3535_v1  ;;  %v323_v2 = vld [vmem:[%s4138_s30] sm:$0xff]  ;;  %v324_v3 = vld [vmem:[%s4138_s30 + $0x8] sm:$0xff]  ;;  %v325_v7 = vld [vmem:[%s4138_s30 + $0x10] sm:$0xff]  ;;  %s5337_s29 = scalar_lea.vmem %s5699_s5, %s3235_s18 }
  0x15   : > { %v387_v4 = vld [vmem:[%s4138_s30 + $0x200] sm:$0xff]  ;;  %v451_v5 = vpack.c.bf16 %v324_v3, %v323_v2  ;;  %v388_v6 = vld [vmem:[%s4138_s30 + $0x208] sm:$0xff]  ;;  %v326_v8 = vld [vmem:[%s4138_s30 + $0x18] sm:$0xff] }
  0x16   : > { %v483_v9 = vpack.c.bf16 %v388_v6, %v387_v4  ;;  %v452_v10 = vpack.c.bf16 %v326_v8, %v325_v7  ;;  %v389_v11 = vld [vmem:[%s4138_s30 + $0x210] sm:$0xff]  ;;  %v390_v12 = vld [vmem:[%s4138_s30 + $0x218] sm:$0xff]  ;;  %v327_v13 = vld [vmem:[%s4138_s30 + $0x20] sm:$0xff] }
  0x17   : > { %3378 = vmatprep.mubr.msk.bf16.mxu0 %vm531_vm0, %v451_v5  ;;  %v484_v14 = vpack.c.bf16 %v390_v12, %v389_v11  ;;  %v328_v15 = vld [vmem:[%s4138_s30 + $0x28] sm:$0xff]  ;;  %v391_v17 = vld [vmem:[%s4138_s30 + $0x220] sm:$0xff]  ;;  %v329_v19 = vld [vmem:[%s4138_s30 + $0x30] sm:$0xff] }
  0x18   : > { %3442 = vmatprep.mubr.msk.bf16.mxu1 %vm531_vm0, %v483_v9  ;;  %3379 = vmatmul.mubr.msk.bf16.vlgmr.msra.gmra.mrb[0].mxu0 %vm531_vm0, %v452_v10  ;;  %v453_v16 = vpack.c.bf16 %v328_v15, %v327_v13  ;;  %v392_v18 = vld [vmem:[%s4138_s30 + $0x228] sm:$0xff]  ;;  %v330_v20 = vld [vmem:[%s4138_s30 + $0x38] sm:$0xff]  ;;  %v393_v22 = vld [vmem:[%s4138_s30 + $0x230] sm:$0xff] }
  0x19   : > { %3443 = vmatmul.mubr.msk.bf16.vlgmr.msra.gmra.mrb[0].mxu1 %vm531_vm0, %v484_v14  ;;  %v485_v21 = vpack.c.bf16 %v392_v18, %v391_v17  ;;  %v394_v23 = vld [vmem:[%s4138_s30 + $0x238] sm:$0xff]  ;;  %v331_v24 = vld [vmem:[%s4138_s30 + $0x40] sm:$0xff]  ;;  %v332_v25 = vld [vmem:[%s4138_s30 + $0x48] sm:$0xff]  ;;  %v454_v28 = vpack.c.bf16 %v330_v20, %v329_v19 }
  0x1a   : > { %3382 = vmatprep.mubr.msk.bf16.mxu0 %vm531_vm0, %v453_v16  ;;  %v395_v26 = vld [vmem:[%s4138_s30 + $0x240] sm:$0xff]  ;;  %v396_v27 = vld [vmem:[%s4138_s30 + $0x248] sm:$0xff]  ;;  %v486_v29 = vpack.c.bf16 %v394_v23, %v393_v22  ;;  %v455_v30 = vpack.c.bf16 %v332_v25, %v331_v24  ;;  %v333_v32 = vld [vmem:[%s4138_s30 + $0x50] sm:$0xff] }
  0x1b   : > { %3446 = vmatprep.mubr.msk.bf16.mxu1 %vm531_vm0, %v485_v21  ;;  %v487_v31 = vpack.c.bf16 %v396_v27, %v395_v26  ;;  %v334_v33 = vld [vmem:[%s4138_s30 + $0x58] sm:$0xff]  ;;  %v397_v34 = vld [vmem:[%s4138_s30 + $0x250] sm:$0xff]  ;;  %v335_v36 = vld [vmem:[%s4138_s30 + $0x60] sm:$0xff] }
  0x1c   : > { %v398_v35 = vld [vmem:[%s4138_s30 + $0x258] sm:$0xff]  ;;  %v336_v37 = vld [vmem:[%s4138_s30 + $0x68] sm:$0xff]  ;;  %v399_v38 = vld [vmem:[%s4138_s30 + $0x260] sm:$0xff]  ;;  %v456_v40 = vpack.c.bf16 %v334_v33, %v333_v32 }
  0x1d   : > { %v400_v39 = vld [vmem:[%s4138_s30 + $0x268] sm:$0xff]  ;;  %v488_v41 = vpack.c.bf16 %v398_v35, %v397_v34  ;;  %v457_v42 = vpack.c.bf16 %v336_v37, %v335_v36  ;;  %v337_v44 = vld [vmem:[%s4138_s30 + $0x70] sm:$0xff]  ;;  %v338_v45 = vld [vmem:[%s4138_s30 + $0x78] sm:$0xff] }
  0x1e   : > { %v489_v43 = vpack.c.bf16 %v400_v39, %v399_v38  ;;  %v401_v46 = vld [vmem:[%s4138_s30 + $0x270] sm:$0xff]  ;;  %v402_v47 = vld [vmem:[%s4138_s30 + $0x278] sm:$0xff]  ;;  %v339_v48 = vld [vmem:[%s4138_s30 + $0x80] sm:$0xff]  ;;  %v458_v52 = vpack.c.bf16 %v338_v45, %v337_v44 }
  0x1f   : > { %v340_v49 = vld [vmem:[%s4138_s30 + $0x88] sm:$0xff]  ;;  %v403_v50 = vld [vmem:[%s4138_s30 + $0x280] sm:$0xff]  ;;  %v490_v53 = vpack.c.bf16 %v402_v47, %v401_v46  ;;  %v341_v56 = vld [vmem:[%s4138_s30 + $0x90] sm:$0xff] }
  0x20   : > { %3383 = vmatmul.mubr.msk.bf16.gmra.mrb[4].mxu0 %vm531_vm0, %v454_v28  ;;  %v404_v51 = vld [vmem:[%s4138_s30 + $0x288] sm:$0xff]  ;;  %v459_v54 = vpack.c.bf16 %v340_v49, %v339_v48  ;;  %v342_v57 = vld [vmem:[%s4138_s30 + $0x98] sm:$0xff]  ;;  %v405_v58 = vld [vmem:[%s4138_s30 + $0x290] sm:$0xff] }
  0x21   : > { %3447 = vmatmul.mubr.msk.bf16.gmra.mrb[4].mxu1 %vm531_vm0, %v486_v29  ;;  %3386 = vmatprep.mubr.msk.bf16.mxu0 %vm531_vm0, %v455_v30  ;;  %v491_v55 = vpack.c.bf16 %v404_v51, %v403_v50  ;;  %v406_v59 = vld [vmem:[%s4138_s30 + $0x298] sm:$0xff]  ;;  %v343_v60 = vld [vmem:[%s4138_s30 + $0xa0] sm:$0xff]  ;;  %v344_v61 = vld [vmem:[%s4138_s30 + $0xa8] sm:$0xff]  ;;  %v460_v0 = vpack.c.bf16 %v342_v57, %v341_v56 }
  0x22   : > { %3450 = vmatprep.mubr.msk.bf16.mxu1 %vm531_vm0, %v487_v31  ;;  %v407_v62 = vld [vmem:[%s4138_s30 + $0x2a0] sm:$0xff]  ;;  %v408_v63 = vld [vmem:[%s4138_s30 + $0x2a8] sm:$0xff]  ;;  %v492_v1 = vpack.c.bf16 %v406_v59, %v405_v58  ;;  %v461_v2 = vpack.c.bf16 %v344_v61, %v343_v60  ;;  %v345_v4 = vld [vmem:[%s4138_s30 + $0xb0] sm:$0xff] }
  0x23   : > { %v493_v3 = vpack.c.bf16 %v408_v63, %v407_v62  ;;  %v346_v5 = vld [vmem:[%s4138_s30 + $0xb8] sm:$0xff]  ;;  %v409_v6 = vld [vmem:[%s4138_s30 + $0x2b0] sm:$0xff]  ;;  %v347_v8 = vld [vmem:[%s4138_s30 + $0xc0] sm:$0xff] }
  0x24   : > { %v410_v7 = vld [vmem:[%s4138_s30 + $0x2b8] sm:$0xff]  ;;  %v348_v9 = vld [vmem:[%s4138_s30 + $0xc8] sm:$0xff]  ;;  %v411_v10 = vld [vmem:[%s4138_s30 + $0x2c0] sm:$0xff]  ;;  %v462_v12 = vpack.c.bf16 %v346_v5, %v345_v4 }
  0x25   : > { %v412_v11 = vld [vmem:[%s4138_s30 + $0x2c8] sm:$0xff]  ;;  %v494_v13 = vpack.c.bf16 %v410_v7, %v409_v6  ;;  %v463_v14 = vpack.c.bf16 %v348_v9, %v347_v8  ;;  %v349_v16 = vld [vmem:[%s4138_s30 + $0xd0] sm:$0xff]  ;;  %v350_v17 = vld [vmem:[%s4138_s30 + $0xd8] sm:$0xff] }
  0x26   : > { %v495_v15 = vpack.c.bf16 %v412_v11, %v411_v10  ;;  %v413_v18 = vld [vmem:[%s4138_s30 + $0x2d0] sm:$0xff]  ;;  %v414_v19 = vld [vmem:[%s4138_s30 + $0x2d8] sm:$0xff]  ;;  %v351_v20 = vld [vmem:[%s4138_s30 + $0xe0] sm:$0xff]  ;;  %v464_v24 = vpack.c.bf16 %v350_v17, %v349_v16 }
  0x27   : > { %v352_v21 = vld [vmem:[%s4138_s30 + $0xe8] sm:$0xff]  ;;  %v415_v22 = vld [vmem:[%s4138_s30 + $0x2e0] sm:$0xff]  ;;  %v496_v25 = vpack.c.bf16 %v414_v19, %v413_v18  ;;  %v353_v28 = vld [vmem:[%s4138_s30 + $0xf0] sm:$0xff] }
  0x28   : > { %3387 = vmatmul.mubr.msk.bf16.gmra.mrb[8].mxu0 %vm531_vm0, %v456_v40  ;;  %v416_v23 = vld [vmem:[%s4138_s30 + $0x2e8] sm:$0xff]  ;;  %v465_v26 = vpack.c.bf16 %v352_v21, %v351_v20  ;;  %v354_v29 = vld [vmem:[%s4138_s30 + $0xf8] sm:$0xff]  ;;  %v417_v30 = vld [vmem:[%s4138_s30 + $0x2f0] sm:$0xff] }
  0x29   : > { %3451 = vmatmul.mubr.msk.bf16.gmra.mrb[8].mxu1 %vm531_vm0, %v488_v41  ;;  %3390 = vmatprep.mubr.msk.bf16.mxu0 %vm531_vm0, %v457_v42  ;;  %v497_v27 = vpack.c.bf16 %v416_v23, %v415_v22  ;;  %v418_v31 = vld [vmem:[%s4138_s30 + $0x2f8] sm:$0xff]  ;;  %v355_v32 = vld [vmem:[%s4138_s30 + $0x100] sm:$0xff]  ;;  %v356_v33 = vld [vmem:[%s4138_s30 + $0x108] sm:$0xff]  ;;  %v466_v36 = vpack.c.bf16 %v354_v29, %v353_v28 }
  0x2a   : > { %3454 = vmatprep.mubr.msk.bf16.mxu1 %vm531_vm0, %v489_v43  ;;  %v419_v34 = vld [vmem:[%s4138_s30 + $0x300] sm:$0xff]  ;;  %v420_v35 = vld [vmem:[%s4138_s30 + $0x308] sm:$0xff]  ;;  %v498_v37 = vpack.c.bf16 %v418_v31, %v417_v30  ;;  %v467_v38 = vpack.c.bf16 %v356_v33, %v355_v32  ;;  %v357_v40 = vld [vmem:[%s4138_s30 + $0x110] sm:$0xff] }
  0x2b   : > { %v499_v39 = vpack.c.bf16 %v420_v35, %v419_v34  ;;  %v358_v41 = vld [vmem:[%s4138_s30 + $0x118] sm:$0xff]  ;;  %v421_v42 = vld [vmem:[%s4138_s30 + $0x310] sm:$0xff]  ;;  %v359_v44 = vld [vmem:[%s4138_s30 + $0x120] sm:$0xff] }
  0x2c   : > { %v422_v43 = vld [vmem:[%s4138_s30 + $0x318] sm:$0xff]  ;;  %v360_v45 = vld [vmem:[%s4138_s30 + $0x128] sm:$0xff]  ;;  %v423_v46 = vld [vmem:[%s4138_s30 + $0x320] sm:$0xff]  ;;  %v468_v48 = vpack.c.bf16 %v358_v41, %v357_v40 }
  0x2d   : > { %v424_v47 = vld [vmem:[%s4138_s30 + $0x328] sm:$0xff]  ;;  %v500_v49 = vpack.c.bf16 %v422_v43, %v421_v42  ;;  %v469_v50 = vpack.c.bf16 %v360_v45, %v359_v44  ;;  %v363_v56 = vld [vmem:[%s4138_s30 + $0x140] sm:$0xff] }
  0x2e   : > { %v501_v51 = vpack.c.bf16 %v424_v47, %v423_v46  ;;  %v364_v57 = vld [vmem:[%s4138_s30 + $0x148] sm:$0xff]  ;;  %v427_v58 = vld [vmem:[%s4138_s30 + $0x340] sm:$0xff] }
  0x2f   : > { %v428_v59 = vld [vmem:[%s4138_s30 + $0x348] sm:$0xff]  ;;  %v471_v62 = vpack.c.bf16 %v364_v57, %v363_v56  ;;  %v367_v4 = vld [vmem:[%s4138_s30 + $0x160] sm:$0xff]  ;;  %v385_v57 = vld [vmem:[%s4138_s30 + $0x1f0] sm:$0xff] }
  0x30   : > { %3391 = vmatmul.mubr.msk.bf16.gmra.mrb[12].mxu0 %vm531_vm0, %v458_v52  ;;  %v361_v52 = vld [vmem:[%s4138_s30 + $0x130] sm:$0xff]  ;;  %v503_v63 = vpack.c.bf16 %v428_v59, %v427_v58  ;;  %v368_v5 = vld [vmem:[%s4138_s30 + $0x168] sm:$0xff]  ;;  %v431_v6 = vld [vmem:[%s4138_s30 + $0x360] sm:$0xff] }
  0x31   : > { %3455 = vmatmul.mubr.msk.bf16.gmra.mrb[12].mxu1 %vm531_vm0, %v490_v53  ;;  %3394 = vmatprep.mubr.msk.bf16.mxu0 %vm531_vm0, %v459_v54  ;;  %v362_v53 = vld [vmem:[%s4138_s30 + $0x138] sm:$0xff]  ;;  %v425_v54 = vld [vmem:[%s4138_s30 + $0x330] sm:$0xff]  ;;  %v432_v7 = vld [vmem:[%s4138_s30 + $0x368] sm:$0xff]  ;;  %v473_v10 = vpack.c.bf16 %v368_v5, %v367_v4 }
  0x32   : > { %3458 = vmatprep.mubr.msk.bf16.mxu1 %vm531_vm0, %v491_v55  ;;  %v426_v55 = vld [vmem:[%s4138_s30 + $0x338] sm:$0xff]  ;;  %v470_v60 = vpack.c.bf16 %v362_v53, %v361_v52  ;;  %v505_v11 = vpack.c.bf16 %v432_v7, %v431_v6  ;;  %v371_v16 = vld [vmem:[%s4138_s30 + $0x180] sm:$0xff]  ;;  %v372_v17 = vld [vmem:[%s4138_s30 + $0x188] sm:$0xff] }
  0x33   : > { %v502_v61 = vpack.c.bf16 %v426_v55, %v425_v54  ;;  %v435_v18 = vld [vmem:[%s4138_s30 + $0x380] sm:$0xff]  ;;  %v436_v19 = vld [vmem:[%s4138_s30 + $0x388] sm:$0xff]  ;;  %v475_v22 = vpack.c.bf16 %v372_v17, %v371_v16  ;;  %v386_v58 = vld [vmem:[%s4138_s30 + $0x1f8] sm:$0xff] }
  0x34   : > { %v507_v23 = vpack.c.bf16 %v436_v19, %v435_v18  ;;  %v375_v28 = vld [vmem:[%s4138_s30 + $0x1a0] sm:$0xff]  ;;  %v376_v29 = vld [vmem:[%s4138_s30 + $0x1a8] sm:$0xff] }
  0x35   : > { %v439_v30 = vld [vmem:[%s4138_s30 + $0x3a0] sm:$0xff]  ;;  %v440_v31 = vld [vmem:[%s4138_s30 + $0x3a8] sm:$0xff]  ;;  %v477_v34 = vpack.c.bf16 %v376_v29, %v375_v28 }
  0x36   : > { %v509_v35 = vpack.c.bf16 %v440_v31, %v439_v30  ;;  %v379_v40 = vld [vmem:[%s4138_s30 + $0x1c0] sm:$0xff]  ;;  %v380_v41 = vld [vmem:[%s4138_s30 + $0x1c8] sm:$0xff] }
  0x37   : > { %v443_v42 = vld [vmem:[%s4138_s30 + $0x3c0] sm:$0xff]  ;;  %v444_v43 = vld [vmem:[%s4138_s30 + $0x3c8] sm:$0xff]  ;;  %v479_v46 = vpack.c.bf16 %v380_v41, %v379_v40 }
  0x38   : > { %3395 = vmatmul.mubr.msk.bf16.gmra.mrb[16].mxu0 %vm531_vm0, %v460_v0  ;;  %v365_v0 = vld [vmem:[%s4138_s30 + $0x150] sm:$0xff]  ;;  %v511_v47 = vpack.c.bf16 %v444_v43, %v443_v42  ;;  %v383_v52 = vld [vmem:[%s4138_s30 + $0x1e0] sm:$0xff]  ;;  %v384_v53 = vld [vmem:[%s4138_s30 + $0x1e8] sm:$0xff] }
  0x39   : > { %3459 = vmatmul.mubr.msk.bf16.gmra.mrb[16].mxu1 %vm531_vm0, %v492_v1  ;;  %3398 = vmatprep.mubr.msk.bf16.mxu0 %vm531_vm0, %v461_v2  ;;  %v366_v1 = vld [vmem:[%s4138_s30 + $0x158] sm:$0xff]  ;;  %v429_v2 = vld [vmem:[%s4138_s30 + $0x350] sm:$0xff]  ;;  %v481_v56 = vpack.c.bf16 %v384_v53, %v383_v52  ;;  %v447_v59 = vld [vmem:[%s4138_s30 + $0x3e0] sm:$0xff] }
  0x3a   : > { %3462 = vmatprep.mubr.msk.bf16.mxu1 %vm531_vm0, %v493_v3  ;;  %v430_v3 = vld [vmem:[%s4138_s30 + $0x358] sm:$0xff]  ;;  %v472_v8 = vpack.c.bf16 %v366_v1, %v365_v0  ;;  %v482_v0 = vpack.c.bf16 %v386_v58, %v385_v57  ;;  %v4340_v4 = vld [vmem:[%s5695_s1 + $0x8] sm:$0xff] }
  0x3b   : > { %v504_v9 = vpack.c.bf16 %v430_v3, %v429_v2  ;;  %v4335_v2 = vld [vmem:[%s5695_s1] sm:$0xff] }
  0x40   : > { %3399 = vmatmul.mubr.msk.bf16.gmra.mrb[20].mxu0 %vm531_vm0, %v462_v12  ;;  %v369_v12 = vld [vmem:[%s4138_s30 + $0x170] sm:$0xff] }
  0x41   : > { %3463 = vmatmul.mubr.msk.bf16.gmra.mrb[20].mxu1 %vm531_vm0, %v494_v13  ;;  %3402 = vmatprep.mubr.msk.bf16.mxu0 %vm531_vm0, %v463_v14  ;;  %v370_v13 = vld [vmem:[%s4138_s30 + $0x178] sm:$0xff]  ;;  %v433_v14 = vld [vmem:[%s4138_s30 + $0x370] sm:$0xff] }
  0x42   : > { %3466 = vmatprep.mubr.msk.bf16.mxu1 %vm531_vm0, %v495_v15  ;;  %v434_v15 = vld [vmem:[%s4138_s30 + $0x378] sm:$0xff]  ;;  %v474_v20 = vpack.c.bf16 %v370_v13, %v369_v12 }
  0x43   : > { %v506_v21 = vpack.c.bf16 %v434_v15, %v433_v14 }
  0x48   : > { %3403 = vmatmul.mubr.msk.bf16.gmra.mrb[24].mxu0 %vm531_vm0, %v464_v24  ;;  %v373_v24 = vld [vmem:[%s4138_s30 + $0x190] sm:$0xff] }
  0x49   : > { %3467 = vmatmul.mubr.msk.bf16.gmra.mrb[24].mxu1 %vm531_vm0, %v496_v25  ;;  %3406 = vmatprep.mubr.msk.bf16.mxu0 %vm531_vm0, %v465_v26  ;;  %v374_v25 = vld [vmem:[%s4138_s30 + $0x198] sm:$0xff]  ;;  %v437_v26 = vld [vmem:[%s4138_s30 + $0x390] sm:$0xff] }
  0x4a   : > { %3470 = vmatprep.mubr.msk.bf16.mxu1 %vm531_vm0, %v497_v27  ;;  %v438_v27 = vld [vmem:[%s4138_s30 + $0x398] sm:$0xff]  ;;  %v476_v32 = vpack.c.bf16 %v374_v25, %v373_v24 }
  0x4b   : > { %v508_v33 = vpack.c.bf16 %v438_v27, %v437_v26  ;;  %v4354_v27 = vld [vmem:[%s5697_s3] ss:$0 sm:$0xff] }
  0x50   : > { %3407 = vmatmul.mubr.msk.bf16.gmra.mrb[28].mxu0 %vm531_vm0, %v466_v36  ;;  %v377_v36 = vld [vmem:[%s4138_s30 + $0x1b0] sm:$0xff] }
  0x51   : > { %3471 = vmatmul.mubr.msk.bf16.gmra.mrb[28].mxu1 %vm531_vm0, %v498_v37  ;;  %3410 = vmatprep.mubr.msk.bf16.mxu0 %vm531_vm0, %v467_v38  ;;  %v378_v37 = vld [vmem:[%s4138_s30 + $0x1b8] sm:$0xff]  ;;  %v441_v38 = vld [vmem:[%s4138_s30 + $0x3b0] sm:$0xff] }
  0x52   : > { %3474 = vmatprep.mubr.msk.bf16.mxu1 %vm531_vm0, %v499_v39  ;;  %v442_v39 = vld [vmem:[%s4138_s30 + $0x3b8] sm:$0xff]  ;;  %v478_v44 = vpack.c.bf16 %v378_v37, %v377_v36 }
  0x53   : > { %v510_v45 = vpack.c.bf16 %v442_v39, %v441_v38 }
  0x58   : > { %3411 = vmatmul.mubr.msk.bf16.gmra.mrb[32].mxu0 %vm531_vm0, %v468_v48  ;;  %v381_v48 = vld [vmem:[%s4138_s30 + $0x1d0] sm:$0xff] }
  0x59   : > { %3475 = vmatmul.mubr.msk.bf16.gmra.mrb[32].mxu1 %vm531_vm0, %v500_v49  ;;  %3414 = vmatprep.mubr.msk.bf16.mxu0 %vm531_vm0, %v469_v50  ;;  %v382_v49 = vld [vmem:[%s4138_s30 + $0x1d8] sm:$0xff]  ;;  %v445_v50 = vld [vmem:[%s4138_s30 + $0x3d0] sm:$0xff] }
  0x5a   : > { %3478 = vmatprep.mubr.msk.bf16.mxu1 %vm531_vm0, %v501_v51  ;;  %v446_v51 = vld [vmem:[%s4138_s30 + $0x3d8] sm:$0xff]  ;;  %v480_v54 = vpack.c.bf16 %v382_v49, %v381_v48 }
  0x5b   : > { %v512_v55 = vpack.c.bf16 %v446_v51, %v445_v50 }
  0x60   : > { %3415 = vmatmul.mubr.msk.bf16.gmra.mrb[36].mxu0 %vm531_vm0, %v470_v60  ;;  %v448_v60 = vld [vmem:[%s4138_s30 + $0x3e8] sm:$0xff] }
  0x61   : > { %3479 = vmatmul.mubr.msk.bf16.gmra.mrb[36].mxu1 %vm531_vm0, %v502_v61  ;;  %3418 = vmatprep.mubr.msk.bf16.mxu0 %vm531_vm0, %v471_v62  ;;  %v513_v61 = vpack.c.bf16 %v448_v60, %v447_v59  ;;  %v449_v62 = vld [vmem:[%s4138_s30 + $0x3f0] sm:$0xff] }
  0x62   : > { %3482 = vmatprep.mubr.msk.bf16.mxu1 %vm531_vm0, %v503_v63  ;;  %v450_v63 = vld [vmem:[%s4138_s30 + $0x3f8] sm:$0xff] }
  0x63   : > { %v514_v1 = vpack.c.bf16 %v450_v63, %v449_v62 }
  0x68   : > { %3419 = vmatmul.mubr.msk.bf16.gmra.mrb[40].mxu0 %vm531_vm0, %v472_v8 }
  0x69   : > { %3483 = vmatmul.mubr.msk.bf16.gmra.mrb[40].mxu1 %vm531_vm0, %v504_v9  ;;  %3422 = vmatprep.mubr.msk.bf16.mxu0 %vm531_vm0, %v473_v10 }
  0x6a   : > { %3486 = vmatprep.mubr.msk.bf16.mxu1 %vm531_vm0, %v505_v11 }
  0x70   : > { %3423 = vmatmul.mubr.msk.bf16.gmra.mrb[44].mxu0 %vm531_vm0, %v474_v20 }
  0x71   : > { %3487 = vmatmul.mubr.msk.bf16.gmra.mrb[44].mxu1 %vm531_vm0, %v506_v21  ;;  %3426 = vmatprep.mubr.msk.bf16.mxu0 %vm531_vm0, %v475_v22 }
  0x72   : > { %3490 = vmatprep.mubr.msk.bf16.mxu1 %vm531_vm0, %v507_v23 }
  0x78   : > { %3427 = vmatmul.mubr.msk.bf16.gmra.mrb[48].mxu0 %vm531_vm0, %v476_v32 }
  0x79   : > { %3491 = vmatmul.mubr.msk.bf16.gmra.mrb[48].mxu1 %vm531_vm0, %v508_v33  ;;  %3430 = vmatprep.mubr.msk.bf16.mxu0 %vm531_vm0, %v477_v34 }
  0x7a   : > { %3494 = vmatprep.mubr.msk.bf16.mxu1 %vm531_vm0, %v509_v35 }
  0x80   : > { %3431 = vmatmul.mubr.msk.bf16.gmra.mrb[52].mxu0 %vm531_vm0, %v478_v44 }
  0x81   : > { %3495 = vmatmul.mubr.msk.bf16.gmra.mrb[52].mxu1 %vm531_vm0, %v510_v45  ;;  %3434 = vmatprep.mubr.msk.bf16.mxu0 %vm531_vm0, %v479_v46 }
  0x82   : > { %3498 = vmatprep.mubr.msk.bf16.mxu1 %vm531_vm0, %v511_v47 }
  0x88   : > { %3435 = vmatmul.mubr.msk.bf16.gmra.mrb[56].mxu0 %vm531_vm0, %v480_v54 }
  0x89   : > { %3499 = vmatmul.mubr.msk.bf16.gmra.mrb[56].mxu1 %vm531_vm0, %v512_v55  ;;  %3438 = vmatprep.mubr.msk.bf16.mxu0 %vm531_vm0, %v481_v56 }
  0x8a   : > { %3502 = vmatprep.mubr.msk.bf16.mxu1 %vm531_vm0, %v513_v61 }
  0x90   : > { %3439 = vmatmul.mubr.msk.bf16.gmra.mrb[60].mxu0 %vm531_vm0, %v482_v0 }
  0x91   : > { %3503 = vmatmul.mubr.msk.bf16.gmra.mrb[60].mxu1 %vm531_vm0, %v514_v1 }
  0xeb   : > { %v3380_v3 = vpop.f32.mrb[0].mxu0 }
  0xec   : > { %v1273_v5 = vadd.f32 %v3380_v3, %v4335_v2  ;;  %v3444_v6 = vpop.f32.mrb[0].mxu1  ;;  %v758_v7 = vpop.f32.mrb[1].mxu0 }
  0xed   : > { %v1337_v8 = vadd.f32 %v3444_v6, %v4335_v2  ;;  %v1271_v9 = vadd.f32 %v4335_v2, %v758_v7  ;;  %v1014_v10 = vpop.f32.mrb[1].mxu1  ;;  %v3381_v11 = vpop.f32.mrb[2].mxu0 }
  0xee   : > { %3536 = vtanh.f32 %v1273_v5  ;;  %v1335_v12 = vadd.f32 %v4335_v2, %v1014_v10  ;;  %v1274_v13 = vadd.f32 %v3381_v11, %v4340_v4  ;;  %v3445_v14 = vpop.f32.mrb[2].mxu1  ;;  %v761_v15 = vpop.f32.mrb[3].mxu0 }
  0xef   : > { %3538 = vtanh.f32 %v1337_v8  ;;  %v1338_v16 = vadd.f32 %v3445_v14, %v4340_v4  ;;  %v1017_v17 = vpop.f32.mrb[3].mxu1  ;;  %v1272_v19 = vadd.f32 %v4340_v4, %v761_v15 }
  0xf0   : > { %3540 = vtanh.f32 %v1271_v9  ;;  %v1336_v18 = vadd.f32 %v4340_v4, %v1017_v17 }
  0xf1   : > { %3542 = vtanh.f32 %v1335_v12 }
  0xf2   : > { %3544 = vtanh.f32 %v1274_v13 }
  0xf3   : > { %3546 = vtanh.f32 %v1338_v16  ;;  %v3384_v20 = vpop.f32.mrb[4].mxu0 }
  0xf4   : > { %v774_v21 = vpop.f32.mrb[5].mxu0  ;;  %v3448_v22 = vpop.f32.mrb[4].mxu1  ;;  %3548 = vtanh.f32 %v1336_v18  ;;  %v1277_v29 = vadd.f32 %v3384_v20, %v4335_v2 }
  0xf5   : > { %v3385_v23 = vpop.f32.mrb[6].mxu0  ;;  %v1030_v24 = vpop.f32.mrb[5].mxu1  ;;  %3550 = vtanh.f32 %v1272_v19  ;;  %v1341_v38 = vadd.f32 %v3448_v22, %v4335_v2  ;;  %v1275_v53 = vadd.f32 %v4335_v2, %v774_v21 }
  0xf6   : > { %v1278_v25 = vadd.f32 %v3385_v23, %v4340_v4  ;;  %v777_v26 = vpop.f32.mrb[7].mxu0  ;;  %v3449_v28 = vpop.f32.mrb[6].mxu1  ;;  %v1339_v62 = vadd.f32 %v4335_v2, %v1030_v24 }
  0xf7   : > { %v1033_v30 = vpop.f32.mrb[7].mxu1  ;;  %v1342_v36 = vadd.f32 %v3449_v28, %v4340_v4  ;;  %v1276_v50 = vadd.f32 %v4340_v4, %v777_v26 }
  0xf8   : > { %v3537_v31 = vpop.eup %3536  ;;  %3552 = vtanh.f32 %v1278_v25  ;;  %v1340_v61 = vadd.f32 %v4340_v4, %v1033_v30 }
  0xf9   : > { %v3539_v32 = vpop.eup %3538  ;;  %v1536_v33 = vmul.f32 %v3537_v31, %v4354_v27  ;;  %3554 = vtanh.f32 %v1277_v29 }
  0xfa   : > { %v3541_v34 = vpop.eup %3540  ;;  %v1600_v35 = vmul.f32 %v3539_v32, %v4354_v27  ;;  %3556 = vtanh.f32 %v1342_v36 }
  0xfb   : > { %v3543_v37 = vpop.eup %3542  ;;  %v1668_v39 = vsel %vm531_vm0, %v1536_v33, 0.0  ;;  %v3388_v40 = vpop.f32.mrb[8].mxu0  ;;  %v1534_v43 = vmul.f32 %v3541_v34, %v4354_v27  ;;  %3558 = vtanh.f32 %v1341_v38 }
  0xfc   : > { %v3545_v41 = vpop.eup %3544  ;;  %v1860_v42 = vsel %vm531_vm0, %v1600_v35, 0.0  ;;  %1669 = vadd.xlane.f32.xlu1 %v1668_v39  ;;  %v4364_v44 = vpop.f32.mrb[9].mxu0  ;;  %v1598_v59 = vmul.f32 %v3543_v37, %v4354_v27  ;;  %3560 = vtanh.f32 %v1276_v50  ;;  %v1281_v15 = vadd.f32 %v3388_v40, %v4335_v2 }
  0xfd   : > { %v3452_v45 = vpop.f32.mrb[8].mxu1  ;;  %v3547_v46 = vpop.eup %3546  ;;  %1861 = vadd.xlane.f32.xlu0 %v1860_v42  ;;  %v1537_v47 = vmul.f32 %v3545_v41, %v4354_v27  ;;  %v1662_v58 = vsel %vm531_vm0, %v1534_v43, 0.0  ;;  %3562 = vtanh.f32 %v1275_v53  ;;  %v1279_v40 = vadd.f32 %v4335_v2, %v4364_v44 }
  0xfe   : > { %v3389_v48 = vpop.f32.mrb[10].mxu0  ;;  %v4367_v49 = vpop.f32.mrb[9].mxu1  ;;  %v1601_v55 = vmul.f32 %v3547_v46, %v4354_v27  ;;  %v1854_v5 = vsel %vm531_vm0, %v1598_v59, 0.0  ;;  %3564 = vtanh.f32 %v1340_v61  ;;  %v1345_v24 = vadd.f32 %v3452_v45, %v4335_v2 }
  0xff   : > { %v793_v51 = vpop.f32.mrb[11].mxu0  ;;  %v3453_v52 = vpop.f32.mrb[10].mxu1  ;;  %v1671_v54 = vsel %vm531_vm0, %v1537_v47, 0.0  ;;  %v1282_v12 = vadd.f32 %v3389_v48, %v4340_v4  ;;  %3566 = vtanh.f32 %v1339_v62  ;;  %v1343_v44 = vadd.f32 %v4335_v2, %v4367_v49 }
 0x100   : > { %v4373_v56 = vpop.f32.mrb[11].mxu1  ;;  %v3549_v57 = vpop.eup %3548  ;;  %1672 = vadd.xlane.f32.xlu1 %v1671_v54  ;;  %v1863_v63 = vsel %vm531_vm0, %v1601_v55, 0.0  ;;  %v1346_v23 = vadd.f32 %v3453_v52, %v4340_v4  ;;  %v1280_v37 = vadd.f32 %v4340_v4, %v793_v51 }
 0x101   : > { %v3551_v60 = vpop.eup %3550  ;;  %1663 = vadd.xlane.f32.xlu0 %v1662_v58  ;;  %v1599_v0 = vmul.f32 %v3549_v57, %v4354_v27  ;;  %3568 = vtanh.f32 %v1282_v12  ;;  %v1344_v50 = vadd.f32 %v4340_v4, %v4373_v56 }
 0x102   : > { %v3553_v3 = vpop.eup %3552  ;;  %v1535_v6 = vmul.f32 %v3551_v60, %v4354_v27  ;;  %3570 = vtanh.f32 %v1281_v15 }
 0x103   : > { %v4381_v1 = vpop.f32.mrb[12].mxu0  ;;  %v3555_v9 = vpop.eup %3554  ;;  %v1857_v16 = vsel %vm531_vm0, %v1599_v0, 0.0  ;;  %v1541_v17 = vmul.f32 %v3553_v3, %v4354_v27  ;;  %3572 = vtanh.f32 %v1346_v23 }
 0x104   : > { %1864 = vadd.xlane.f32.xlu1 %v1863_v63  ;;  %v4385_v7 = vpop.f32.mrb[13].mxu0  ;;  %v4387_v8 = vpop.f32.mrb[12].mxu1  ;;  %v1665_v20 = vsel %vm531_vm0, %v1535_v6, 0.0  ;;  %v1540_v21 = vmul.f32 %v3555_v9, %v4354_v27  ;;  %3574 = vtanh.f32 %v1345_v24  ;;  %v1285_v0 = vadd.f32 %v4381_v1, %v4335_v2 }
 0x105   : > { %1855 = vadd.xlane.f32.xlu0 %v1854_v5  ;;  %v4389_v10 = vpop.f32.mrb[14].mxu0  ;;  %v4391_v11 = vpop.f32.mrb[13].mxu1  ;;  %v1683_v25 = vsel %vm531_vm0, %v1541_v17, 0.0  ;;  %3576 = vtanh.f32 %v1280_v37  ;;  %v1349_v1 = vadd.f32 %v4387_v8, %v4335_v2 }
 0x106   : > { %v4394_v13 = vpop.f32.mrb[15].mxu0  ;;  %v4396_v14 = vpop.f32.mrb[14].mxu1  ;;  %v1680_v30 = vsel %vm531_vm0, %v1540_v21, 0.0  ;;  %3578 = vtanh.f32 %v1279_v40  ;;  %v1286_v61 = vadd.f32 %v4389_v10, %v4340_v4 }
 0x107   : > { %v4401_v18 = vpop.f32.mrb[15].mxu1  ;;  %v3557_v19 = vpop.eup %3556  ;;  %3580 = vtanh.f32 %v1344_v50 }
 0x108   : > { %1858 = vadd.xlane.f32.xlu1 %v1857_v16  ;;  %v3559_v22 = vpop.eup %3558  ;;  %v1605_v26 = vmul.f32 %v3557_v19, %v4354_v27  ;;  %3582 = vtanh.f32 %v1343_v44  ;;  %v1350_v16 = vadd.f32 %v4396_v14, %v4340_v4 }
 0x109   : > { %1666 = vadd.xlane.f32.xlu0 %v1665_v20  ;;  %v3561_v29 = vpop.eup %3560  ;;  %v1604_v31 = vmul.f32 %v3559_v22, %v4354_v27  ;;  %3584 = vtanh.f32 %v1286_v61 }
 0x10a   : > { %v3563_v34 = vpop.eup %3562  ;;  %v1875_v41 = vsel %vm531_vm0, %v1605_v26, 0.0  ;;  %v1539_v42 = vmul.f32 %v3561_v29, %v4354_v27  ;;  %3586 = vtanh.f32 %v1285_v0  ;;  %v1284_v29 = vadd.f32 %v4340_v4, %v4394_v13 }
 0x10b   : > { %v4409_v28 = vpop.f32.mrb[16].mxu0  ;;  %v3565_v45 = vpop.eup %3564  ;;  %v1872_v46 = vsel %vm531_vm0, %v1604_v31, 0.0  ;;  %v1538_v47 = vmul.f32 %v3563_v34, %v4354_v27  ;;  %3588 = vtanh.f32 %v1350_v16  ;;  %v1283_v34 = vadd.f32 %v4335_v2, %v4385_v7 }
 0x10c   : > { %1684 = vadd.xlane.f32.xlu1 %v1683_v25  ;;  %v4413_v32 = vpop.f32.mrb[17].mxu0  ;;  %v4415_v33 = vpop.f32.mrb[16].mxu1  ;;  %v1677_v51 = vsel %vm531_vm0, %v1539_v42, 0.0  ;;  %v1603_v52 = vmul.f32 %v3565_v45, %v4354_v27  ;;  %3590 = vtanh.f32 %v1349_v1  ;;  %v1347_v7 = vadd.f32 %v4335_v2, %v4391_v11 }
 0x10d   : > { %1681 = vadd.xlane.f32.xlu0 %v1680_v30  ;;  %v4417_v35 = vpop.f32.mrb[18].mxu0  ;;  %v4419_v36 = vpop.f32.mrb[17].mxu1  ;;  %v1674_v55 = vsel %vm531_vm0, %v1538_v47, 0.0  ;;  %3592 = vtanh.f32 %v1284_v29  ;;  %v1348_v47 = vadd.f32 %v4340_v4, %v4401_v18 }
 0x10e   : > { %v4422_v38 = vpop.f32.mrb[19].mxu0  ;;  %v4424_v39 = vpop.f32.mrb[18].mxu1  ;;  %v1869_v3 = vsel %vm531_vm0, %v1603_v52, 0.0  ;;  %3594 = vtanh.f32 %v1283_v34  ;;  %v1290_v61 = vadd.f32 %v4417_v35, %v4340_v4 }
 0x10f   : > { %v4430_v43 = vpop.f32.mrb[19].mxu1  ;;  %v3567_v48 = vpop.eup %3566  ;;  %3596 = vtanh.f32 %v1348_v47 }
 0x110   : > { %1876 = vadd.xlane.f32.xlu1 %v1875_v41  ;;  %v3569_v54 = vpop.eup %3568  ;;  %v1602_v57 = vmul.f32 %v3567_v48, %v4354_v27  ;;  %3598 = vtanh.f32 %v1347_v7 }
 0x111   : > { %1873 = vadd.xlane.f32.xlu0 %v1872_v46  ;;  %v3571_v56 = vpop.eup %3570  ;;  %v1545_v5 = vmul.f32 %v3569_v54, %v4354_v27  ;;  %3600 = vtanh.f32 %v1290_v61 }
 0x112   : > { %v3573_v9 = vpop.eup %3572  ;;  %v1866_v12 = vsel %vm531_vm0, %v1602_v57, 0.0  ;;  %v1544_v10 = vmul.f32 %v3571_v56, %v4354_v27 }
 0x113   : > { %v4440_v53 = vpop.f32.mrb[20].mxu0  ;;  %v3575_v15 = vpop.eup %3574  ;;  %v1695_v17 = vsel %vm531_vm0, %v1545_v5, 0.0  ;;  %v1609_v19 = vmul.f32 %v3573_v9, %v4354_v27  ;;  %v1289_v5 = vadd.f32 %v4409_v28, %v4335_v2  ;;  %v1353_v28 = vadd.f32 %v4415_v33, %v4335_v2 }
 0x114   : > { %1678 = vadd.xlane.f32.xlu1 %v1677_v51  ;;  %v4444_v58 = vpop.f32.mrb[21].mxu0  ;;  %v4446_v59 = vpop.f32.mrb[20].mxu1  ;;  %v1692_v22 = vsel %vm531_vm0, %v1544_v10, 0.0  ;;  %v1608_v23 = vmul.f32 %v3575_v15, %v4354_v27 }
 0x115   : > { %1675 = vadd.xlane.f32.xlu0 %v1674_v55  ;;  %v4448_v60 = vpop.f32.mrb[22].mxu0  ;;  %v4450_v49 = vpop.f32.mrb[21].mxu1  ;;  %v1887_v37 = vsel %vm531_vm0, %v1609_v19, 0.0  ;;  %3602 = vtanh.f32 %v1289_v5 }
 0x116   : > { %v4454_v62 = vpop.f32.mrb[23].mxu0  ;;  %v4456_v63 = vpop.f32.mrb[22].mxu1  ;;  %v1884_v45 = vsel %vm531_vm0, %v1608_v23, 0.0 }
 0x117   : > { %v4462_v6 = vpop.f32.mrb[23].mxu1  ;;  %v3577_v21 = vpop.eup %3576 }
 0x118   : > { %1870 = vadd.xlane.f32.xlu1 %v1869_v3  ;;  %v3579_v14 = vpop.eup %3578  ;;  %v1543_v40 = vmul.f32 %v3577_v21, %v4354_v27 }
 0x119   : > { %1867 = vadd.xlane.f32.xlu0 %v1866_v12  ;;  %v3581_v42 = vpop.eup %3580  ;;  %v1542_v13 = vmul.f32 %v3579_v14, %v4354_v27 }
 0x11a   : > { %v3583_v46 = vpop.eup %3582  ;;  %v1689_v48 = vsel %vm531_vm0, %v1543_v40, 0.0  ;;  %v1607_v50 = vmul.f32 %v3581_v42, %v4354_v27  ;;  %v1288_v42 = vadd.f32 %v4340_v4, %v4422_v38 }
 0x11b   : > { %v4472_v20 = vpop.f32.mrb[24].mxu0  ;;  %v3585_v51 = vpop.eup %3584  ;;  %v1686_v52 = vsel %vm531_vm0, %v1542_v13, 0.0  ;;  %v1606_v54 = vmul.f32 %v3583_v46, %v4354_v27  ;;  %v1287_v46 = vadd.f32 %v4335_v2, %v4413_v32  ;;  %v1351_v32 = vadd.f32 %v4335_v2, %v4419_v36 }
 0x11c   : > { %1696 = vadd.xlane.f32.xlu1 %v1695_v17  ;;  %v4476_v24 = vpop.f32.mrb[25].mxu0  ;;  %v4478_v25 = vpop.f32.mrb[24].mxu1  ;;  %v1881_v9 = vsel %vm531_vm0, %v1607_v50, 0.0  ;;  %v1549_v12 = vmul.f32 %v3585_v51, %v4354_v27  ;;  %v1354_v17 = vadd.f32 %v4424_v39, %v4340_v4 }
 0x11d   : > { %1693 = vadd.xlane.f32.xlu0 %v1692_v22  ;;  %v4480_v26 = vpop.f32.mrb[26].mxu0  ;;  %v4482_v8 = vpop.f32.mrb[25].mxu1  ;;  %v1878_v16 = vsel %vm531_vm0, %v1606_v54, 0.0  ;;  %v1352_v54 = vadd.f32 %v4340_v4, %v4430_v43 }
 0x11e   : > { %v4486_v30 = vpop.f32.mrb[27].mxu0  ;;  %v4488_v31 = vpop.f32.mrb[26].mxu1  ;;  %v1707_v19 = vsel %vm531_vm0, %v1549_v12, 0.0  ;;  %3604 = vtanh.f32 %v1354_v17  ;;  %v1294_v17 = vadd.f32 %v4448_v60, %v4340_v4 }
 0x11f   : > { %v4494_v41 = vpop.f32.mrb[27].mxu1  ;;  %v3587_v18 = vpop.eup %3586  ;;  %3606 = vtanh.f32 %v1353_v28 }
 0x120   : > { %1888 = vadd.xlane.f32.xlu1 %v1887_v37  ;;  %v3589_v15 = vpop.eup %3588  ;;  %v1548_v35 = vmul.f32 %v3587_v18, %v4354_v27  ;;  %3608 = vtanh.f32 %v1288_v42 }
 0x121   : > { %1885 = vadd.xlane.f32.xlu0 %v1884_v45  ;;  %v3591_v1 = vpop.eup %3590  ;;  %v1613_v21 = vmul.f32 %v3589_v15, %v4354_v27  ;;  %3610 = vtanh.f32 %v1287_v46 }
 0x122   : > { %v3593_v23 = vpop.eup %3592  ;;  %v1704_v14 = vsel %vm531_vm0, %v1548_v35, 0.0  ;;  %v1612_v29 = vmul.f32 %v3591_v1, %v4354_v27  ;;  %3612 = vtanh.f32 %v1352_v54 }
 0x123   : > { %v4504_v44 = vpop.f32.mrb[28].mxu0  ;;  %v3595_v39 = vpop.eup %3594  ;;  %v1899_v47 = vsel %vm531_vm0, %v1613_v21, 0.0  ;;  %v1547_v7 = vmul.f32 %v3593_v23, %v4354_v27  ;;  %3614 = vtanh.f32 %v1351_v32  ;;  %v1293_v21 = vadd.f32 %v4440_v53, %v4335_v2 }
 0x124   : > { %1690 = vadd.xlane.f32.xlu1 %v1689_v48  ;;  %v4508_v55 = vpop.f32.mrb[29].mxu0  ;;  %v4510_v57 = vpop.f32.mrb[28].mxu1  ;;  %v1896_v51 = vsel %vm531_vm0, %v1612_v29, 0.0  ;;  %v1546_v38 = vmul.f32 %v3595_v39, %v4354_v27  ;;  %3616 = vtanh.f32 %v1294_v17  ;;  %v1357_v53 = vadd.f32 %v4446_v59, %v4335_v2 }
 0x125   : > { %1687 = vadd.xlane.f32.xlu0 %v1686_v52  ;;  %v4512_v56 = vpop.f32.mrb[30].mxu0  ;;  %v4514_v11 = vpop.f32.mrb[29].mxu1  ;;  %v1701_v18 = vsel %vm531_vm0, %v1547_v7, 0.0  ;;  %3618 = vtanh.f32 %v1293_v21 }
 0x126   : > { %v4518_v0 = vpop.f32.mrb[31].mxu0  ;;  %v4520_v3 = vpop.f32.mrb[30].mxu1  ;;  %v1698_v12 = vsel %vm531_vm0, %v1546_v38, 0.0 }
 0x127   : > { %v4526_v10 = vpop.f32.mrb[31].mxu1  ;;  %v3597_v50 = vpop.eup %3596 }
 0x128   : > { %1882 = vadd.xlane.f32.xlu1 %v1881_v9  ;;  %v3599_v52 = vpop.eup %3598  ;;  %v1611_v61 = vmul.f32 %v3597_v50, %v4354_v27 }
 0x129   : > { %1879 = vadd.xlane.f32.xlu0 %v1878_v16  ;;  %v3601_v9 = vpop.eup %3600  ;;  %v1610_v15 = vmul.f32 %v3599_v52, %v4354_v27 }
 0x12a   : > { %v3603_v43 = vpop.eup %3602  ;;  %v1893_v23 = vsel %vm531_vm0, %v1611_v61, 0.0 }
 0x12b   : > { %v4536_v22 = vpop.f32.mrb[32].mxu0  ;;  %v3605_v39 = vpop.eup %3604  ;;  %v1890_v42 = vsel %vm531_vm0, %v1610_v15, 0.0  ;;  %v1552_v60 = vmul.f32 %v3603_v43, %v4354_v27  ;;  %v1291_v43 = vadd.f32 %v4335_v2, %v4444_v58  ;;  %v1355_v58 = vadd.f32 %v4335_v2, %v4450_v49 }
 0x12c   : > { %1708 = vadd.xlane.f32.xlu1 %v1707_v19  ;;  %v4540_v34 = vpop.f32.mrb[33].mxu0  ;;  %v4542_v37 = vpop.f32.mrb[32].mxu1  ;;  %v1617_v50 = vmul.f32 %v3605_v39, %v4354_v27 }
 0x12d   : > { %1705 = vadd.xlane.f32.xlu0 %v1704_v14  ;;  %v4544_v40 = vpop.f32.mrb[34].mxu0  ;;  %v4546_v33 = vpop.f32.mrb[33].mxu1  ;;  %v1553_v14 = vmul.f32 %v3601_v9, %v4354_v27  ;;  %v1716_v52 = vsel %vm531_vm0, %v1552_v60, 0.0  ;;  %v1292_v9 = vadd.f32 %v4340_v4, %v4454_v62  ;;  %v1356_v60 = vadd.f32 %v4340_v4, %v4462_v6 }
 0x12e   : > { %v4550_v45 = vpop.f32.mrb[35].mxu0  ;;  %v4552_v13 = vpop.f32.mrb[34].mxu1  ;;  %v1911_v17 = vsel %vm531_vm0, %v1617_v50, 0.0 }
 0x12f   : > { %v4558_v48 = vpop.f32.mrb[35].mxu1  ;;  %v3607_v46 = vpop.eup %3606  ;;  %v1719_v7 = vsel %vm531_vm0, %v1553_v14, 0.0 }
 0x130   : > { %1900 = vadd.xlane.f32.xlu1 %v1899_v47  ;;  %v1358_v47 = vadd.f32 %v4456_v63, %v4340_v4  ;;  %v3609_v38 = vpop.eup %3608  ;;  %v1616_v54 = vmul.f32 %v3607_v46, %v4354_v27 }
 0x131   : > { %1897 = vadd.xlane.f32.xlu0 %v1896_v51  ;;  %v3611_v63 = vpop.eup %3610  ;;  %v1551_v21 = vmul.f32 %v3609_v38, %v4354_v27 }
 0x132   : > { %3620 = vtanh.f32 %v1358_v47  ;;  %v3613_v14 = vpop.eup %3612  ;;  %v1908_v39 = vsel %vm531_vm0, %v1616_v54, 0.0  ;;  %v1550_v62 = vmul.f32 %v3611_v63, %v4354_v27 }
 0x133   : > { %v4568_v5 = vpop.f32.mrb[36].mxu0  ;;  %3622 = vtanh.f32 %v1357_v53  ;;  %v1713_v46 = vsel %vm531_vm0, %v1551_v21, 0.0  ;;  %v1615_v47 = vmul.f32 %v3613_v14, %v4354_v27  ;;  %v1297_v21 = vadd.f32 %v4472_v20, %v4335_v2 }
 0x134   : > { %1702 = vadd.xlane.f32.xlu1 %v1701_v18  ;;  %v4572_v16 = vpop.f32.mrb[37].mxu0  ;;  %v4574_v35 = vpop.f32.mrb[36].mxu1  ;;  %3624 = vtanh.f32 %v1292_v9  ;;  %v1710_v50 = vsel %vm531_vm0, %v1550_v62, 0.0  ;;  %v1298_v9 = vadd.f32 %v4480_v26, %v4340_v4  ;;  %v1361_v20 = vadd.f32 %v4478_v25, %v4335_v2 }
 0x135   : > { %1699 = vadd.xlane.f32.xlu0 %v1698_v12  ;;  %v4576_v1 = vpop.f32.mrb[38].mxu0  ;;  %v4578_v36 = vpop.f32.mrb[37].mxu1  ;;  %3626 = vtanh.f32 %v1291_v43  ;;  %v1905_v14 = vsel %vm531_vm0, %v1615_v47, 0.0 }
 0x136   : > { %v4582_v28 = vpop.f32.mrb[39].mxu0  ;;  %v4584_v19 = vpop.f32.mrb[38].mxu1  ;;  %3628 = vtanh.f32 %v1356_v60 }
 0x137   : > { %v4590_v29 = vpop.f32.mrb[39].mxu1  ;;  %3630 = vtanh.f32 %v1355_v58  ;;  %v1362_v58 = vadd.f32 %v4488_v31, %v4340_v4 }
 0x138   : > { %1894 = vadd.xlane.f32.xlu1 %v1893_v23  ;;  %3632 = vtanh.f32 %v1298_v9 }
 0x139   : > { %1891 = vadd.xlane.f32.xlu0 %v1890_v42  ;;  %v3615_v42 = vpop.eup %3614  ;;  %3634 = vtanh.f32 %v1297_v21 }
 0x13a   : > { %v1614_v38 = vmul.f32 %v3615_v42, %v4354_v27  ;;  %3636 = vtanh.f32 %v1362_v58 }
 0x13b   : > { %v4600_v51 = vpop.f32.mrb[40].mxu0  ;;  %3638 = vtanh.f32 %v1361_v20 }
 0x13c   : > { %1720 = vadd.xlane.f32.xlu1 %v1719_v7  ;;  %v4604_v32 = vpop.f32.mrb[41].mxu0  ;;  %v4606_v18 = vpop.f32.mrb[40].mxu1  ;;  %v1902_v60 = vsel %vm531_vm0, %v1614_v38, 0.0 }
 0x13d   : > { %1717 = vadd.xlane.f32.xlu0 %v1716_v52  ;;  %v4608_v61 = vpop.f32.mrb[42].mxu0  ;;  %v4610_v59 = vpop.f32.mrb[41].mxu1 }
 0x13e   : > { %v4614_v12 = vpop.f32.mrb[43].mxu0  ;;  %v4616_v15 = vpop.f32.mrb[42].mxu1 }
 0x13f   : > { %v4622_v23 = vpop.f32.mrb[43].mxu1  ;;  %v3617_v7 = vpop.eup %3616 }
 0x140   : > { %1912 = vadd.xlane.f32.xlu1 %v1911_v17  ;;  %v3619_v6 = vpop.eup %3618 }
 0x141   : > { %1909 = vadd.xlane.f32.xlu0 %v1908_v39  ;;  %v1557_v39 = vmul.f32 %v3617_v7, %v4354_v27  ;;  %v3621_v42 = vpop.eup %3620  ;;  %v1556_v26 = vmul.f32 %v3619_v6, %v4354_v27 }
 0x142   : > { %v1621_v7 = vmul.f32 %v3621_v42, %v4354_v27 }
 0x143   : > { %v4632_v53 = vpop.f32.mrb[44].mxu0  ;;  %v1731_v47 = vsel %vm531_vm0, %v1557_v39, 0.0  ;;  %v1296_v39 = vadd.f32 %v4340_v4, %v4486_v30 }
 0x144   : > { %1714 = vadd.xlane.f32.xlu1 %v1713_v46  ;;  %v4636_v52 = vpop.f32.mrb[45].mxu0  ;;  %v4638_v54 = vpop.f32.mrb[44].mxu1 }
 0x145   : > { %1711 = vadd.xlane.f32.xlu0 %v1710_v50  ;;  %v4640_v63 = vpop.f32.mrb[46].mxu0  ;;  %v4642_v49 = vpop.f32.mrb[45].mxu1  ;;  %3640 = vtanh.f32 %v1296_v39 }
 0x146   : > { %v4646_v43 = vpop.f32.mrb[47].mxu0  ;;  %v4648_v17 = vpop.f32.mrb[46].mxu1 }
 0x147   : > { %v4654_v62 = vpop.f32.mrb[47].mxu1  ;;  %v3623_v46 = vpop.eup %3622 }
 0x148   : > { %1906 = vadd.xlane.f32.xlu1 %v1905_v14  ;;  %v3625_v38 = vpop.eup %3624  ;;  %v1728_v14 = vsel %vm531_vm0, %v1556_v26, 0.0  ;;  %v1620_v6 = vmul.f32 %v3623_v46, %v4354_v27  ;;  %v1295_v46 = vadd.f32 %v4335_v2, %v4476_v24  ;;  %v1359_v24 = vadd.f32 %v4335_v2, %v4482_v8 }
 0x149   : > { %1903 = vadd.xlane.f32.xlu0 %v1902_v60  ;;  %v3627_v31 = vpop.eup %3626 }
 0x14a   : > { %v1554_v30 = vmul.f32 %v3627_v31, %v4354_v27  ;;  %3642 = vtanh.f32 %v1295_v46 }
 0x14b   : > { %v4664_v50 = vpop.f32.mrb[48].mxu0 }
 0x14c   : > { %1732 = vadd.xlane.f32.xlu1 %v1731_v47  ;;  %v4668_v9 = vpop.f32.mrb[49].mxu0  ;;  %v4670_v60 = vpop.f32.mrb[48].mxu1  ;;  %v1923_v47 = vsel %vm531_vm0, %v1621_v7, 0.0 }
 0x14d   : > { %5700 = vst [vmem:[#allocation2_spill] sm:$0xff] %v4670_v60  ;;  %1729 = vadd.xlane.f32.xlu0 %v1728_v14  ;;  %v4672_v21 = vpop.f32.mrb[50].mxu0  ;;  %v4674_v25 = vpop.f32.mrb[49].mxu1  ;;  %v1555_v14 = vmul.f32 %v3625_v38, %v4354_v27 }
 0x14e   : > { %5701 = vst [vmem:[#allocation3_spill] sm:$0xff] %v4672_v21  ;;  %5702 = vst [vmem:[#allocation4_spill] sm:$0xff] %v4674_v25  ;;  %v4678_v42 = vpop.f32.mrb[51].mxu0  ;;  %v4680_v26 = vpop.f32.mrb[50].mxu1  ;;  %v1920_v25 = vsel %vm531_vm0, %v1620_v6, 0.0 }
 0x14f   : > { %5703 = vst [vmem:[#allocation5_spill] sm:$0xff] %v4680_v26  ;;  %v4686_v60 = vpop.f32.mrb[51].mxu1  ;;  %v3629_v21 = vpop.eup %3628  ;;  %v1360_v26 = vadd.f32 %v4340_v4, %v4494_v41  ;;  %v1725_v20 = vsel %vm531_vm0, %v1555_v14, 0.0 }
 0x150   : > { %1924 = vadd.xlane.f32.xlu1 %v1923_v47  ;;  %v3631_v58 = vpop.eup %3630  ;;  %v1619_v7 = vmul.f32 %v3629_v21, %v4354_v27  ;;  %v1722_v47 = vsel %vm531_vm0, %v1554_v30, 0.0  ;;  %v1302_v21 = vadd.f32 %v4512_v56, %v4340_v4 }
 0x151   : > { %1921 = vadd.xlane.f32.xlu0 %v1920_v25  ;;  %v3633_v6 = vpop.eup %3632  ;;  %v1618_v31 = vmul.f32 %v3631_v58, %v4354_v27  ;;  %3644 = vtanh.f32 %v1360_v26  ;;  %v1301_v58 = vadd.f32 %v4504_v44, %v4335_v2  ;;  %v1365_v44 = vadd.f32 %v4510_v57, %v4335_v2 }
 0x152   : > { %v3635_v41 = vpop.eup %3634  ;;  %3646 = vtanh.f32 %v1359_v24  ;;  %v1366_v24 = vadd.f32 %v4520_v3, %v4340_v4 }
 0x153   : > { %v4696_v38 = vpop.f32.mrb[52].mxu0  ;;  %v1914_v26 = vsel %vm531_vm0, %v1618_v31, 0.0  ;;  %v1560_v56 = vmul.f32 %v3635_v41, %v4354_v27  ;;  %3648 = vtanh.f32 %v1302_v21 }
 0x154   : > { %1726 = vadd.xlane.f32.xlu1 %v1725_v20  ;;  %v4700_v25 = vpop.f32.mrb[53].mxu0  ;;  %v4702_v39 = vpop.f32.mrb[52].mxu1  ;;  %v1917_v20 = vsel %vm531_vm0, %v1619_v7, 0.0  ;;  %3650 = vtanh.f32 %v1301_v58 }
 0x155   : > { %5704 = vst [vmem:[#allocation6_spill] sm:$0xff] %v4702_v39  ;;  %1723 = vadd.xlane.f32.xlu0 %v1722_v47  ;;  %v4704_v46 = vpop.f32.mrb[54].mxu0  ;;  %v4706_v8 = vpop.f32.mrb[53].mxu1  ;;  %v1561_v47 = vmul.f32 %v3633_v6, %v4354_v27  ;;  %3652 = vtanh.f32 %v1366_v24 }
 0x156   : > { %5705 = vst [vmem:[#allocation7_spill] sm:$0xff] %v4704_v46  ;;  %5706 = vst [vmem:[#allocation8_spill] sm:$0xff] %v4706_v8  ;;  %v4710_v14 = vpop.f32.mrb[55].mxu0  ;;  %v4712_v30 = vpop.f32.mrb[54].mxu1  ;;  %3654 = vtanh.f32 %v1365_v44 }
 0x157   : > { %v4718_v39 = vpop.f32.mrb[55].mxu1  ;;  %v3637_v46 = vpop.eup %3636  ;;  %v1743_v7 = vsel %vm531_vm0, %v1561_v47, 0.0 }
 0x158   : > { %5707 = vst [vmem:[#allocation9_spill] sm:$0xff] %v4718_v39  ;;  %1918 = vadd.xlane.f32.xlu1 %v1917_v20  ;;  %v3639_v8 = vpop.eup %3638  ;;  %v1625_v6 = vmul.f32 %v3637_v46, %v4354_v27  ;;  %v1740_v20 = vsel %vm531_vm0, %v1560_v56, 0.0  ;;  %v1300_v46 = vadd.f32 %v4340_v4, %v4518_v0 }
 0x159   : > { %1915 = vadd.xlane.f32.xlu0 %v1914_v26  ;;  %v3641_v31 = vpop.eup %3640  ;;  %v1624_v41 = vmul.f32 %v3639_v8, %v4354_v27  ;;  %v1299_v8 = vadd.f32 %v4335_v2, %v4508_v55  ;;  %v1363_v55 = vadd.f32 %v4335_v2, %v4514_v11 }
 0x15a   : > { %v3643_v3 = vpop.eup %3642  ;;  %3656 = vtanh.f32 %v1300_v46 }
 0x15b   : > { %v4728_v39 = vpop.f32.mrb[56].mxu0  ;;  %v1558_v0 = vmul.f32 %v3643_v3, %v4354_v27  ;;  %3658 = vtanh.f32 %v1299_v8 }
 0x15c   : > { %1744 = vadd.xlane.f32.xlu1 %v1743_v7  ;;  %v4732_v21 = vpop.f32.mrb[57].mxu0  ;;  %v4734_v26 = vpop.f32.mrb[56].mxu1  ;;  %v1935_v7 = vsel %vm531_vm0, %v1625_v6, 0.0 }
 0x15d   : > { %5708 = vst [vmem:[#allocation10_spill] sm:$0xff] %v4734_v26  ;;  %1741 = vadd.xlane.f32.xlu0 %v1740_v20  ;;  %v4736_v58 = vpop.f32.mrb[58].mxu0  ;;  %v4738_v57 = vpop.f32.mrb[57].mxu1  ;;  %v1559_v20 = vmul.f32 %v3641_v31, %v4354_v27 }
 0x15e   : > { %5709 = vst [vmem:[#allocation11_spill] sm:$0xff] %v4736_v58  ;;  %5710 = vst [vmem:[#allocation12_spill] sm:$0xff] %v4738_v57  ;;  %v4742_v47 = vpop.f32.mrb[59].mxu0  ;;  %v4744_v56 = vpop.f32.mrb[58].mxu1  ;;  %v1932_v57 = vsel %vm531_vm0, %v1624_v41, 0.0 }
 0x15f   : > { %5711 = vst [vmem:[#allocation13_spill] sm:$0xff] %v4744_v56  ;;  %v4750_v26 = vpop.f32.mrb[59].mxu1  ;;  %v3645_v58 = vpop.eup %3644  ;;  %v1364_v56 = vadd.f32 %v4340_v4, %v4526_v10  ;;  %v1737_v44 = vsel %vm531_vm0, %v1559_v20, 0.0 }
 0x160   : > { %1936 = vadd.xlane.f32.xlu1 %v1935_v7  ;;  %v3647_v24 = vpop.eup %3646  ;;  %v1623_v6 = vmul.f32 %v3645_v58, %v4354_v27  ;;  %v1734_v7 = vsel %vm531_vm0, %v1558_v0, 0.0  ;;  %v1306_v58 = vadd.f32 %v4544_v40, %v4340_v4 }
 0x161   : > { %1933 = vadd.xlane.f32.xlu0 %v1932_v57  ;;  %v3649_v41 = vpop.eup %3648  ;;  %v1622_v3 = vmul.f32 %v3647_v24, %v4354_v27  ;;  %3660 = vtanh.f32 %v1364_v56  ;;  %v1305_v24 = vadd.f32 %v4536_v22, %v4335_v2  ;;  %v1369_v22 = vadd.f32 %v4542_v37, %v4335_v2 }
 0x162   : > { %v3651_v10 = vpop.eup %3650  ;;  %3662 = vtanh.f32 %v1363_v55  ;;  %v1370_v55 = vadd.f32 %v4552_v13, %v4340_v4  ;;  %v1303_v13 = vadd.f32 %v4335_v2, %v4540_v34  ;;  %v4812_v34 = vld [vmem:[%s5695_s1] sm:$0xff] }
 0x163   : > { %v4760_v31 = vpop.f32.mrb[60].mxu0  ;;  %v1926_v56 = vsel %vm531_vm0, %v1622_v3, 0.0  ;;  %v1564_v40 = vmul.f32 %v3651_v10, %v4354_v27  ;;  %3664 = vtanh.f32 %v1306_v58  ;;  %v1304_v58 = vadd.f32 %v4340_v4, %v4550_v45  ;;  %v4805_v4 = vld [vmem:[%s5695_s1 + $0x8] sm:$0xff] }
 0x164   : > { %1738 = vadd.xlane.f32.xlu1 %v1737_v44  ;;  %v4764_v57 = vpop.f32.mrb[61].mxu0  ;;  %v4766_v46 = vpop.f32.mrb[60].mxu1  ;;  %v1929_v44 = vsel %vm531_vm0, %v1623_v6, 0.0  ;;  %3666 = vtanh.f32 %v1305_v24  ;;  %v1368_v2 = vadd.f32 %v4805_v4, %v4558_v48  ;;  %v1367_v45 = vadd.f32 %v4812_v34, %v4546_v33 }
 0x165   : > { %5712 = vst [vmem:[#allocation14_spill] sm:$0xff] %v4764_v57  ;;  %5713 = vst [vmem:[#allocation15_spill] sm:$0xff] %v4766_v46  ;;  %1735 = vadd.xlane.f32.xlu0 %v1734_v7  ;;  %v4768_v8 = vpop.f32.mrb[62].mxu0  ;;  %v4770_v11 = vpop.f32.mrb[61].mxu1  ;;  %v1565_v7 = vmul.f32 %v3649_v41, %v4354_v27  ;;  %v1752_v3 = vsel %vm531_vm0, %v1564_v40, 0.0  ;;  %3668 = vtanh.f32 %v1370_v55  ;;  %v1309_v48 = vadd.f32 %v4812_v34, %v4568_v5 }
 0x166   : > { %5714 = vst [vmem:[#allocation16_spill] sm:$0xff] %v4770_v11  ;;  %v4774_v20 = vpop.f32.mrb[63].mxu0  ;;  %v4776_v0 = vpop.f32.mrb[62].mxu1  ;;  %3670 = vtanh.f32 %v1369_v22  ;;  %v1310_v33 = vadd.f32 %v4805_v4, %v4576_v1  ;;  %v1371_v1 = vadd.f32 %v4812_v34, %v4578_v36 }
 0x167   : > { %5715 = vst [vmem:[#allocation17_spill] sm:$0xff] %v4776_v0  ;;  %v4782_v46 = vpop.f32.mrb[63].mxu1  ;;  %v3653_v57 = vpop.eup %3652  ;;  %v1755_v6 = vsel %vm531_vm0, %v1565_v7, 0.0  ;;  %3672 = vtanh.f32 %v1304_v58 }
 0x168   : > { %1930 = vadd.xlane.f32.xlu1 %v1929_v44  ;;  %v3655_v11 = vpop.eup %3654  ;;  %v1629_v41 = vmul.f32 %v3653_v57, %v4354_v27  ;;  %3674 = vtanh.f32 %v1303_v13 }
 0x169   : > { %1927 = vadd.xlane.f32.xlu0 %v1926_v56  ;;  %v3657_v0 = vpop.eup %3656  ;;  %v1628_v10 = vmul.f32 %v3655_v11, %v4354_v27  ;;  %3676 = vtanh.f32 %v1368_v2 }
 0x16a   : > { %v3659_v44 = vpop.eup %3658  ;;  %v1947_v37 = vsel %vm531_vm0, %v1629_v41, 0.0  ;;  %v1563_v57 = vmul.f32 %v3657_v0, %v4354_v27  ;;  %3678 = vtanh.f32 %v1367_v45  ;;  %v1314_v45 = vadd.f32 %v4805_v4, %v4608_v61 }
 0x16b   : > { %v3661_v24 = vpop.eup %3660  ;;  %v1944_v7 = vsel %vm531_vm0, %v1628_v10, 0.0  ;;  %v1562_v11 = vmul.f32 %v3659_v44, %v4354_v27  ;;  %v1308_v44 = vadd.f32 %v4805_v4, %v4582_v28  ;;  %3680 = vtanh.f32 %v1309_v48 }
 0x16c   : > { %1756 = vadd.xlane.f32.xlu1 %v1755_v6  ;;  %v3663_v56 = vpop.eup %3662  ;;  %v1749_v0 = vsel %vm531_vm0, %v1563_v57, 0.0  ;;  %v1627_v40 = vmul.f32 %v3661_v24, %v4354_v27  ;;  %v1374_v28 = vadd.f32 %v4805_v4, %v4584_v19  ;;  %v1375_v61 = vadd.f32 %v4812_v34, %v4610_v59 }
 0x16d   : > { %1753 = vadd.xlane.f32.xlu0 %v1752_v3  ;;  %v3665_v55 = vpop.eup %3664  ;;  %v1746_v22 = vsel %vm531_vm0, %v1562_v11, 0.0  ;;  %v1626_v6 = vmul.f32 %v3663_v56, %v4354_v27  ;;  %v1307_v3 = vadd.f32 %v4812_v34, %v4572_v16  ;;  %v1373_v16 = vadd.f32 %v4812_v34, %v4574_v35 }
 0x16e   : > { %v3667_v41 = vpop.eup %3666  ;;  %v1941_v10 = vsel %vm531_vm0, %v1627_v40, 0.0  ;;  %v1569_v58 = vmul.f32 %v3665_v55, %v4354_v27  ;;  %v1313_v56 = vadd.f32 %v4812_v34, %v4600_v51  ;;  %v1312_v55 = vadd.f32 %v4805_v4, %v4614_v12 }
 0x16f   : > { %v3669_v5 = vpop.eup %3668  ;;  %v1938_v13 = vsel %vm531_vm0, %v1626_v6, 0.0  ;;  %3682 = vtanh.f32 %v1307_v3  ;;  %v1378_v12 = vadd.f32 %v4805_v4, %v4616_v15  ;;  %v1317_v15 = vadd.f32 %v4812_v34, %v4632_v53 }
 0x170   : > { %1948 = vadd.xlane.f32.xlu1 %v1947_v37  ;;  %v1568_v37 = vmul.f32 %v3667_v41, %v4354_v27  ;;  %v3671_v57 = vpop.eup %3670  ;;  %3684 = vtanh.f32 %v1310_v33  ;;  %v1767_v24 = vsel %vm531_vm0, %v1569_v58, 0.0  ;;  %v4844_v27 = vld [vmem:[%s5697_s3] ss:$0 sm:$0xff]  ;;  %v1316_v53 = vadd.f32 %v4805_v4, %v4646_v43 }
 0x171   : > { %1945 = vadd.xlane.f32.xlu0 %v1944_v7  ;;  %3686 = vtanh.f32 %v1308_v44  ;;  %v1372_v7 = vadd.f32 %v4805_v4, %v4590_v29  ;;  %v1633_v35 = vmul.f32 %v4844_v27, %v3669_v5  ;;  %v3673_v11 = vpop.eup %3672  ;;  %v1632_v19 = vmul.f32 %v4844_v27, %v3671_v57 }
 0x172   : > { %3688 = vtanh.f32 %v1373_v16  ;;  %v1764_v36 = vsel %vm531_vm0, %v1568_v37, 0.0  ;;  %v3675_v2 = vpop.eup %3674  ;;  %v1311_v29 = vadd.f32 %v4812_v34, %v4604_v32  ;;  %v1567_v40 = vmul.f32 %v4844_v27, %v3673_v11 }
 0x173   : > { %3690 = vtanh.f32 %v1371_v1  ;;  %v1956_v51 = vsel %vm531_vm0, %v1632_v19, 0.0  ;;  %v1566_v48 = vmul.f32 %v4844_v27, %v3675_v2  ;;  %v1377_v32 = vadd.f32 %v4812_v34, %v4606_v18 }
 0x174   : > { %1750 = vadd.xlane.f32.xlu1 %v1749_v0  ;;  %3692 = vtanh.f32 %v1374_v28  ;;  %v1959_v0 = vsel %vm531_vm0, %v1633_v35, 0.0  ;;  %v1761_v33 = vsel %vm531_vm0, %v1567_v40, 0.0  ;;  %v1376_v18 = vadd.f32 %v4805_v4, %v4622_v23 }
 0x175   : > { %1747 = vadd.xlane.f32.xlu0 %v1746_v22  ;;  %3694 = vtanh.f32 %v1372_v7  ;;  %v3677_v22 = vpop.eup %3676  ;;  %v1758_v58 = vsel %vm531_vm0, %v1566_v48, 0.0  ;;  %v1318_v23 = vadd.f32 %v4805_v4, %v4640_v63  ;;  %v1381_v63 = vadd.f32 %v4812_v34, %v4638_v54  ;;  %v5716_v48 = vld [vmem:[#allocation3_spill] sm:$0xff] }
 0x176   : > { %3696 = vtanh.f32 %v1313_v56  ;;  %v3679_v6 = vpop.eup %3678  ;;  %v1379_v11 = vadd.f32 %v4812_v34, %v4642_v49  ;;  %v1382_v19 = vadd.f32 %v4805_v4, %v4648_v17  ;;  %v1321_v17 = vadd.f32 %v4812_v34, %v4664_v50 }
 0x177   : > { %3698 = vtanh.f32 %v1311_v29  ;;  %v3681_v41 = vpop.eup %3680  ;;  %v1630_v59 = vmul.f32 %v4844_v27, %v3679_v6  ;;  %v1380_v29 = vadd.f32 %v4805_v4, %v4654_v62 }
 0x178   : > { %1942 = vadd.xlane.f32.xlu1 %v1941_v10  ;;  %3700 = vtanh.f32 %v1314_v45  ;;  %v1631_v10 = vmul.f32 %v4844_v27, %v3677_v22  ;;  %v1319_v22 = vadd.f32 %v4812_v34, %v4668_v9 }
 0x179   : > { %1939 = vadd.xlane.f32.xlu0 %v1938_v13  ;;  %v4867_v3 = vpop.eup %3682  ;;  %3702 = vtanh.f32 %v1312_v55  ;;  %v1315_v13 = vadd.f32 %v4812_v34, %v4636_v52  ;;  %v1572_v52 = vmul.f32 %v4844_v27, %v3681_v41  ;;  %v1320_v41 = vadd.f32 %v4805_v4, %v4678_v42 }
 0x17a   : > { %v3685_v44 = vpop.eup %3684  ;;  %3704 = vtanh.f32 %v1377_v32  ;;  %v1953_v57 = vsel %vm531_vm0, %v1631_v10, 0.0  ;;  %v1322_v32 = vadd.f32 %v4805_v4, %v5716_v48  ;;  %v5717_v10 = vld [vmem:[#allocation2_spill] sm:$0xff] }
 0x17b   : > { %v3687_v5 = vpop.eup %3686  ;;  %3706 = vtanh.f32 %v1375_v61  ;;  %v1573_v1 = vmul.f32 %v4844_v27, %v3685_v44  ;;  %v1776_v49 = vsel %vm531_vm0, %v1572_v52, 0.0  ;;  %v1325_v52 = vadd.f32 %v4812_v34, %v4696_v38 }
 0x17c   : > { %1768 = vadd.xlane.f32.xlu1 %v1767_v24  ;;  %v3689_v16 = vpop.eup %3688  ;;  %3708 = vtanh.f32 %v1378_v12  ;;  %v1950_v24 = vsel %vm531_vm0, %v1630_v59, 0.0  ;;  %v1571_v61 = vmul.f32 %v4844_v27, %v3687_v5  ;;  %v5718_v59 = vld [vmem:[#allocation4_spill] sm:$0xff] }
 0x17d   : > { %1765 = vadd.xlane.f32.xlu0 %v1764_v36  ;;  %v4881_v37 = vpop.eup %3690  ;;  %3710 = vtanh.f32 %v1376_v18  ;;  %v1779_v54 = vsel %vm531_vm0, %v1573_v1, 0.0  ;;  %v1385_v18 = vadd.f32 %v4812_v34, %v5717_v10  ;;  %v1383_v42 = vadd.f32 %v4812_v34, %v5718_v59 }
 0x17e   : > { %v3693_v28 = vpop.eup %3692  ;;  %3712 = vtanh.f32 %v1317_v15  ;;  %v1384_v1 = vadd.f32 %v4805_v4, %v4686_v60  ;;  %v1323_v60 = vadd.f32 %v4812_v34, %v4700_v25 }
 0x17f   : > { %v3695_v7 = vpop.eup %3694  ;;  %3714 = vtanh.f32 %v1315_v13  ;;  %v1637_v2 = vmul.f32 %v4844_v27, %v3693_v28  ;;  %v5719_v13 = vld [vmem:[#allocation5_spill] sm:$0xff] }
 0x180   : > { %1960 = vadd.xlane.f32.xlu1 %v1959_v0  ;;  %v4895_v36 = vpop.eup %3696  ;;  %3716 = vtanh.f32 %v1318_v23  ;;  %v1636_v0 = vmul.f32 %v4844_v27, %v3689_v16  ;;  %v1773_v23 = vsel %vm531_vm0, %v1571_v61, 0.0 }
 0x181   : > { %1957 = vadd.xlane.f32.xlu0 %v1956_v51  ;;  %v4901_v56 = vpop.eup %3698  ;;  %3718 = vtanh.f32 %v1316_v53  ;;  %v1971_v50 = vsel %vm531_vm0, %v1637_v2, 0.0 }
 0x182   : > { %v3701_v45 = vpop.eup %3700  ;;  %3720 = vtanh.f32 %v1381_v63  ;;  %v1968_v9 = vsel %vm531_vm0, %v1636_v0, 0.0 }
 0x183   : > { %v4911_v40 = vpop.eup %3702  ;;  %3722 = vtanh.f32 %v1379_v11 }
 0x184   : > { %1762 = vadd.xlane.f32.xlu1 %v1761_v33  ;;  %v4917_v62 = vpop.eup %3704  ;;  %3724 = vtanh.f32 %v1382_v19  ;;  %v1570_v33 = vmul.f32 %v4844_v27, %v4867_v3  ;;  %v1386_v3 = vadd.f32 %v4805_v4, %v5719_v13 }
 0x185   : > { %1759 = vadd.xlane.f32.xlu0 %v1758_v58  ;;  %v4923_v6 = vpop.eup %3706  ;;  %3726 = vtanh.f32 %v1380_v29  ;;  %v1577_v29 = vmul.f32 %v4844_v27, %v3701_v45 }
 0x186   : > { %v3709_v12 = vpop.eup %3708  ;;  %3728 = vtanh.f32 %v1321_v17  ;;  %v1770_v28 = vsel %vm531_vm0, %v1570_v33, 0.0  ;;  %v1576_v17 = vmul.f32 %v4844_v27, %v4895_v36  ;;  %v1390_v36 = vadd.f32 %v4805_v4, %v4712_v30 }
 0x187   : > { %v4934_v44 = vpop.eup %3710  ;;  %3730 = vtanh.f32 %v1319_v22  ;;  %v5721_v22 = vld [vmem:[#allocation6_spill] sm:$0xff]  ;;  %v1791_v33 = vsel %vm531_vm0, %v1577_v29, 0.0  ;;  %v1641_v10 = vmul.f32 %v4844_v27, %v3709_v12  ;;  %v1329_v30 = vadd.f32 %v4812_v34, %v4728_v39 }
 0x188   : > { %1954 = vadd.xlane.f32.xlu1 %v1953_v57  ;;  %v4940_v15 = vpop.eup %3712  ;;  %3732 = vtanh.f32 %v1322_v32  ;;  %v1635_v57 = vmul.f32 %v4844_v27, %v3695_v7  ;;  %v1389_v48 = vadd.f32 %v4812_v34, %v5721_v22  ;;  %v1788_v13 = vsel %vm531_vm0, %v1576_v17, 0.0  ;;  %v5725_v29 = vld [vmem:[#allocation10_spill] sm:$0xff]  ;;  %v5726_v17 = vld [vmem:[#allocation13_spill] sm:$0xff] }
 0x189   : > { %1951 = vadd.xlane.f32.xlu0 %v1950_v24  ;;  %v4891_v35 = vpop.xlane.xlu1 %1669  ;;  %v4946_v16 = vpop.eup %3714  ;;  %3734 = vtanh.f32 %v1320_v41  ;;  %v1634_v24 = vmul.f32 %v4844_v27, %v4881_v37  ;;  %v1983_v39 = vsel %vm531_vm0, %v1641_v10, 0.0  ;;  %v1638_v10 = vmul.f32 %v4844_v27, %v4923_v6 }
 0x18a   : > { %v4897_v43 = vpop.xlane.xlu0 %1861  ;;  %v4952_v53 = vpop.eup %3716  ;;  %3736 = vtanh.f32 %v1385_v18  ;;  %v1965_v38 = vsel %vm531_vm0, %v1635_v57, 0.0  ;;  %v5723_v18 = vld [vmem:[#allocation9_spill] sm:$0xff]  ;;  %v1327_v57 = vadd.f32 %v4812_v34, %v4732_v21 }
 0x18b   : > { %v4959_v63 = vpop.eup %3718  ;;  %3738 = vtanh.f32 %v1383_v42  ;;  %v1962_v25 = vsel %vm531_vm0, %v1634_v24, 0.0  ;;  %v1388_v59 = vadd.f32 %v4805_v4, %v5723_v18  ;;  %v5724_v24 = vld [vmem:[#allocation11_spill] sm:$0xff] }
 0x18c   : > { %1780 = vadd.xlane.f32.xlu1 %v1779_v54  ;;  %v4965_v11 = vpop.eup %3720  ;;  %3740 = vtanh.f32 %v1386_v3  ;;  %v5720_v54 = vld [vmem:[#allocation7_spill] sm:$0xff]  ;;  %v1640_v3 = vmul.f32 %v4844_v27, %v4917_v62  ;;  %v1330_v62 = vadd.f32 %v4805_v4, %v5724_v24 }
 0x18d   : > { %1777 = vadd.xlane.f32.xlu0 %v1776_v49  ;;  %v4913_v55 = vpop.xlane.xlu1 %1672  ;;  %v1326_v37 = vadd.f32 %v4805_v4, %v5720_v54  ;;  %v4971_v2 = vpop.eup %3722  ;;  %3742 = vtanh.f32 %v1384_v1  ;;  %v1324_v49 = vadd.f32 %v4805_v4, %v4710_v14  ;;  %v1328_v54 = vadd.f32 %v4805_v4, %v4742_v47 }
 0x18e   : > { %v4919_v51 = vpop.xlane.xlu0 %1663  ;;  %v4977_v0 = vpop.eup %3724  ;;  %3744 = vtanh.f32 %v1325_v52  ;;  %v1394_v47 = vadd.f32 %v4805_v4, %v5726_v17 }
 0x18f   : > { %v4984_v32 = vpop.eup %3726  ;;  %3746 = vtanh.f32 %v1323_v60  ;;  %v1575_v60 = vmul.f32 %v4844_v27, %v4911_v40 }
 0x190   : > { %1972 = vadd.xlane.f32.xlu1 %v1971_v50  ;;  %v5722_v50 = vld [vmem:[#allocation8_spill] sm:$0xff]  ;;  %v4990_v61 = vpop.eup %3728  ;;  %3748 = vtanh.f32 %v1326_v37  ;;  %v1980_v37 = vsel %vm531_vm0, %v1640_v3, 0.0 }
 0x191   : > { %1969 = vadd.xlane.f32.xlu0 %v1968_v9  ;;  %v4936_v58 = vpop.xlane.xlu1 %1864  ;;  %v1387_v14 = vadd.f32 %v4812_v34, %v5722_v50  ;;  %v4996_v9 = vpop.eup %3730  ;;  %3750 = vtanh.f32 %v1324_v49  ;;  %v1393_v49 = vadd.f32 %v4812_v34, %v5725_v29 }
 0x192   : > { %v4942_v5 = vpop.xlane.xlu0 %1855  ;;  %v5002_v42 = vpop.eup %3732  ;;  %3752 = vtanh.f32 %v1389_v48 }
 0x193   : > { %3754 = vtanh.f32 %v1387_v14  ;;  %v1639_v14 = vmul.f32 %v4844_v27, %v4934_v44 }
 0x194   : > { %1774 = vadd.xlane.f32.xlu1 %v1773_v23  ;;  %v5009_v23 = vpop.eup %3734  ;;  %3756 = vtanh.f32 %v1390_v36 }
 0x195   : > { %1771 = vadd.xlane.f32.xlu0 %v1770_v28  ;;  %v4961_v7 = vpop.xlane.xlu1 %1858  ;;  %v5015_v1 = vpop.eup %3736  ;;  %3758 = vtanh.f32 %v1388_v59  ;;  %v2446_v59 = vlaneseq  ;;  %v1977_v6 = vsel %vm531_vm0, %v1639_v14, 0.0 }
 0x196   : > { %v4967_v19 = vpop.xlane.xlu0 %1666  ;;  %v5021_v52 = vpop.eup %3738  ;;  %3760 = vtanh.f32 %v1329_v30 }
 0x197   : > { %v5028_v21 = vpop.eup %3740  ;;  %3762 = vtanh.f32 %v1327_v57  ;;  %v1581_v57 = vmul.f32 %v4844_v27, %v4952_v53  ;;  %v2449_v53 = vshrl.u32 %v2446_v59, 7 }
 0x198   : > { %1966 = vadd.xlane.f32.xlu1 %v1965_v38  ;;  %v1574_v38 = vmul.f32 %v4844_v27, %v4901_v56  ;;  %3764 = vtanh.f32 %v1330_v62  ;;  %v1785_v56 = vsel %vm531_vm0, %v1575_v60, 0.0  ;;  %v1974_v62 = vsel %vm531_vm0, %v1638_v10, 0.0 }
 0x199   : > { %1963 = vadd.xlane.f32.xlu0 %v1962_v25  ;;  %v4986_v45 = vpop.xlane.xlu1 %1684  ;;  %v5035_v25 = vpop.eup %3742  ;;  %3766 = vtanh.f32 %v1328_v54  ;;  %v2447_v60 = vand.u32 127, %v2446_v59  ;;  %v1584_v59 = vmul.f32 %v4844_v27, %v4990_v61 }
 0x19a   : > { %v4992_v41 = vpop.xlane.xlu0 %1681  ;;  %v5041_v22 = vpop.eup %3744  ;;  %3768 = vtanh.f32 %v1393_v49 }
 0x19b   : > { %v5043_v50 = vpop.eup %3746  ;;  %3770 = vtanh.f32 %v1394_v47 }
 0x19c   : > { %1792 = vadd.xlane.f32.xlu1 %v1791_v33  ;;  %v5048_v36 = vpop.eup %3748  ;;  %v1782_v33 = vsel %vm531_vm0, %v1574_v38, 0.0  ;;  %3772 = vtanh.f32 %v4891_v35  ;;  %v1580_v35 = vmul.f32 %v4844_v27, %v4940_v15  ;;  %v2452_v38 = vadd.s32 4294967288, %v2447_v60 }
 0x19d   : > { %1789 = vadd.xlane.f32.xlu0 %v1788_v13  ;;  %v5011_v12 = vpop.xlane.xlu1 %1876  ;;  %v5053_v18 = vpop.eup %3750  ;;  %3774 = vtanh.f32 %v4897_v43  ;;  %v1803_v15 = vsel %vm531_vm0, %v1581_v57, 0.0  ;;  %v1582_v57 = vmul.f32 %v4844_v27, %v4996_v9  ;;  %v1649_v9 = vmul.f32 %v4844_v27, %v5028_v21 }
 0x19e   : > { %v5017_v28 = vpop.xlane.xlu0 %1873  ;;  %v5057_v3 = vpop.eup %3752  ;;  %3776 = vtanh.f32 %v4913_v55  ;;  %v1800_v49 = vsel %vm531_vm0, %v1580_v35, 0.0  ;;  %v1648_v35 = vmul.f32 %v4844_v27, %v5015_v1 }
 0x19f   : > { %v5062_v30 = vpop.eup %3754  ;;  %3778 = vtanh.f32 %v4919_v51  ;;  %v1645_v51 = vmul.f32 %v4844_v27, %v4977_v0  ;;  %v1578_v0 = vmul.f32 %v4844_v27, %v4946_v16  ;;  %v1642_v16 = vmul.f32 %v4844_v27, %v4971_v2 }
 0x1a0   : > { %1984 = vadd.xlane.f32.xlu1 %v1983_v39  ;;  %v5068_v24 = vpop.eup %3756  ;;  %3780 = vtanh.f32 %v4936_v58  ;;  %v1644_v58 = vmul.f32 %v4844_v27, %v4965_v11  ;;  %v1579_v11 = vmul.f32 %v4844_v27, %v4959_v63  ;;  %v1643_v63 = vmul.f32 %v4844_v27, %v4984_v32 }
 0x1a1   : > { %1981 = vadd.xlane.f32.xlu0 %v1980_v37  ;;  %v5037_v40 = vpop.xlane.xlu1 %1678  ;;  %v5074_v39 = vpop.eup %3758  ;;  %3782 = vtanh.f32 %v4967_v19  ;;  %v1794_v2 = vsel %vm531_vm0, %v1578_v0, 0.0  ;;  %v1589_v0 = vmul.f32 %v4844_v27, %v5048_v36 }
 0x1a2   : > { %v1676_v48 = vpop.xlane.xlu0 %1675  ;;  %v5079_v54 = vpop.eup %3760  ;;  %3784 = vtanh.f32 %v4942_v5  ;;  %v1797_v61 = vsel %vm531_vm0, %v1579_v11, 0.0  ;;  %v1989_v1 = vsel %vm531_vm0, %v1643_v63, 0.0 }
 0x1a3   : > { %v5084_v37 = vpop.eup %3762  ;;  %3786 = vtanh.f32 %v4961_v7  ;;  %v5114_v7 = vsub.s32 %v2452_v38, %v2449_v53 }
 0x1a4   : > { %1786 = vadd.xlane.f32.xlu1 %v1785_v56  ;;  %v5090_v29 = vpop.eup %3764  ;;  %v5105_v56 = vsub.s32 %v2447_v60, %v2449_v53  ;;  %3788 = vtanh.f32 %v4986_v45  ;;  %v1992_v45 = vsel %vm531_vm0, %v1644_v58, 0.0  ;;  %v5161_v58 = vsel %vm531_vm0, %v1648_v35, 0.0 }
 0x1a5   : > { %1783 = vadd.xlane.f32.xlu0 %v1782_v33  ;;  %v5055_v13 = vpop.xlane.xlu1 %1870  ;;  %v5096_v17 = vpop.eup %3766  ;;  %3790 = vtanh.f32 %v5037_v40  ;;  %v1995_v33 = vsel %vm531_vm0, %v1645_v51, 0.0  ;;  %v5203_v35 = vsel %vm531_vm0, %v1589_v0, 0.0 }
 0x1a6   : > { %v5060_v44 = vpop.xlane.xlu0 %1867  ;;  %v5103_v47 = vpop.eup %3768  ;;  %3792 = vtanh.f32 %v1676_v48  ;;  %v1585_v48 = vmul.f32 %v4844_v27, %v5002_v42  ;;  %v1986_v42 = vsel %vm531_vm0, %v1642_v16, 0.0  ;;  %v5727_v16 = vld [vmem:[#allocation12_spill] sm:$0xff] }
 0x1a7   : > { %v5112_v14 = vpop.eup %3770  ;;  %3794 = vtanh.f32 %v4992_v41  ;;  %v1583_v41 = vmul.f32 %v4844_v27, %v5009_v23  ;;  %v1812_v23 = vsel %vm531_vm0, %v1584_v59, 0.0 }
 0x1a8   : > { %1978 = vadd.xlane.f32.xlu1 %v1977_v6  ;;  %v5120_v10 = vpop.eup %3772  ;;  %3796 = vtanh.f32 %v5011_v12  ;;  %v1646_v12 = vmul.f32 %v4844_v27, %v5021_v52  ;;  %v5156_v52 = vsel %vm531_vm0, %v1582_v57, 0.0 }
 0x1a9   : > { %1975 = vadd.xlane.f32.xlu0 %v1974_v62  ;;  %v5077_v43 = vpop.xlane.xlu1 %1696  ;;  %v5127_v6 = vpop.eup %3774  ;;  %3798 = vtanh.f32 %v5055_v13  ;;  %v1647_v13 = vmul.f32 %v4844_v27, %v5035_v25  ;;  %v5165_v25 = vsel %vm531_vm0, %v1583_v41, 0.0  ;;  %v2176_v57 = vmul.f32 10.0, %v5120_v10 }
 0x1aa   : > { %v5082_v55 = vpop.xlane.xlu0 %1693  ;;  %v3777_v62 = vpop.eup %3776  ;;  %3800 = vtanh.f32 %v5060_v44  ;;  %v1588_v44 = vmul.f32 %v4844_v27, %v5041_v22  ;;  %v2007_v22 = vsel %vm531_vm0, %v1649_v9, 0.0 }
 0x1ab   : > { %v3779_v60 = vpop.eup %3778  ;;  %v5180_v36 = vsel %vm531_vm0, %v1647_v13, 0.0 }
 0x1ac   : > { %1804 = vadd.xlane.f32.xlu1 %v1803_v15  ;;  %v5147_v53 = vpop.eup %3780  ;;  %v1815_v15 = vsel %vm531_vm0, %v1585_v48, 0.0  ;;  %v5199_v48 = vmul.f32 %v4844_v27, %v5043_v50 }
 0x1ad   : > { %1801 = vadd.xlane.f32.xlu0 %v1800_v49  ;;  %v5099_v19 = vpop.xlane.xlu1 %1888  ;;  %v3783_v38 = vpop.eup %3782 }
 0x1ae   : > { %v5108_v5 = vpop.xlane.xlu0 %1885  ;;  %v3785_v51 = vpop.eup %3784  ;;  %v2175_v59 = vmul.f32 10.0, %v3783_v38  ;;  %v5225_v38 = vmul.f32 10.0, %v5127_v6 }
 0x1af   : > { %v3787_v11 = vpop.eup %3786 }
 0x1b0   : > { %1996 = vadd.xlane.f32.xlu1 %v1995_v33  ;;  %v5172_v33 = vsel %vm531_vm0, %v1646_v12, 0.0  ;;  %v3789_v63 = vpop.eup %3788  ;;  %v2239_v10 = vmul.f32 10.0, %v3787_v11 }
 0x1b1   : > { %1993 = vadd.xlane.f32.xlu0 %v1992_v45  ;;  %v1691_v40 = vpop.xlane.xlu1 %1690  ;;  %v5176_v45 = vadd.f32 %v4812_v34, %v5727_v16  ;;  %v5191_v34 = vsel %vm531_vm0, %v1588_v44, 0.0  ;;  %v5238_v16 = vmul.f32 10.0, %v3789_v63 }
 0x1b2   : > { %v1688_v32 = vpop.xlane.xlu0 %1687  ;;  %3802 = vtanh.f32 %v1691_v40  ;;  %v3791_v40 = vpop.eup %3790  ;;  %v2745_v0 = vrot.slane %v2239_v10, %v5114_v7 }
 0x1b3   : > { %3804 = vtanh.f32 %v1688_v32  ;;  %v2174_v32 = vmul.f32 10.0, %v3779_v60  ;;  %v2456_v60 = vrot.slane %v2175_v59, %v5114_v7 }
 0x1b4   : > { %1798 = vadd.xlane.f32.xlu1 %v1797_v61  ;;  %3806 = vtanh.f32 %v5017_v28  ;;  %v1587_v28 = vmul.f32 %v4844_v27, %v5053_v18  ;;  %v3793_v18 = vpop.eup %3792 }
 0x1b5   : > { %1795 = vadd.xlane.f32.xlu0 %v1794_v2  ;;  %v1883_v21 = vpop.xlane.xlu1 %1882  ;;  %3808 = vtanh.f32 %v5077_v43  ;;  %v5195_v43 = vadd.f32 %v4805_v4, %v4750_v26  ;;  %v3795_v41 = vpop.eup %3794  ;;  %v2238_v26 = vmul.f32 10.0, %v3785_v51  ;;  %v5208_v4 = vmul.f32 %v4844_v27, %v5057_v3 }
 0x1b6   : > { %v1880_v49 = vpop.xlane.xlu0 %1879  ;;  %3810 = vtanh.f32 %v1883_v21  ;;  %v3797_v50 = vpop.eup %3796  ;;  %v5212_v9 = vsel %vm531_vm0, %v1587_v28, 0.0  ;;  %v5222_v3 = vmul.f32 %v4844_v27, %v5068_v24  ;;  %v2462_v21 = vrot.slane %v2176_v57, %v5105_v56 }
 0x1b7   : > { %3812 = vtanh.f32 %v1880_v49  ;;  %v3799_v12 = vpop.eup %3798  ;;  %v2741_v49 = vrot.slane %v2238_v26, %v5105_v56  ;;  %v5233_v24 = vmul.f32 10.0, %v5147_v53  ;;  %v5240_v59 = vmul.f32 10.0, %v3795_v41 }
 0x1b8   : > { %1990 = vadd.xlane.f32.xlu1 %v1989_v1  ;;  %3814 = vtanh.f32 %v5082_v55  ;;  %v2179_v1 = vmul.f32 10.0, %v3791_v40  ;;  %v3801_v55 = vpop.eup %3800  ;;  %v2243_v63 = vmul.f32 10.0, %v3799_v12 }
 0x1b9   : > { %1987 = vadd.xlane.f32.xlu0 %v1986_v42  ;;  %v1709_v2 = vpop.xlane.xlu1 %1708  ;;  %v2177_v42 = vmul.f32 10.0, %v3777_v62  ;;  %v2178_v62 = vmul.f32 10.0, %v3793_v18  ;;  %v2746_v26 = vsel %vm2457_vm1, %v2745_v0, %v2741_v49 }
 0x1ba   : > { %v1706_v61 = vpop.xlane.xlu0 %1705  ;;  %3816 = vtanh.f32 %v1709_v2  ;;  %v2475_v40 = vrot.slane %v2179_v1, %v5114_v7  ;;  %v2242_v2 = vmul.f32 10.0, %v3801_v55  ;;  %v2480_v1 = vrot.slane %v5240_v59, %v5105_v56 }
 0x1bb   : > { %3818 = vtanh.f32 %v1706_v61  ;;  %v2466_v51 = vrot.slane %v2177_v42, %v5114_v7  ;;  %v2471_v28 = vrot.slane %v2178_v62, %v5105_v56 }
 0x1bc   : > { %1816 = vadd.xlane.f32.xlu1 %v1815_v15  ;;  %v2451_v15 = vrot.slane %v2174_v32, %v5105_v56  ;;  %3820 = vtanh.f32 %v5099_v19  ;;  %v3803_v44 = vpop.eup %3802  ;;  %v2750_v32 = vrot.slane %v5225_v38, %v5105_v56 }
 0x1bd   : > { %1813 = vadd.xlane.f32.xlu0 %v1812_v23  ;;  %v1901_v13 = vpop.xlane.xlu1 %1900  ;;  %3822 = vtanh.f32 %v5108_v5  ;;  %v3805_v6 = vpop.eup %3804  ;;  %v2183_v18 = vmul.f32 10.0, %v3803_v44  ;;  %v2467_v61 = vsel %vm2457_vm1, %v2466_v51, %v2462_v21  ;;  %v2759_v21 = vrot.slane %v2242_v2, %v5105_v56 }
 0x1be   : > { %v1898_v23 = vpop.xlane.xlu0 %1897  ;;  %v2458_v11 = vsel %vm2457_vm1, %v2456_v60, %v2451_v15  ;;  %3824 = vtanh.f32 %v1901_v13  ;;  %v3807_v19 = vpop.eup %3806  ;;  %v2182_v41 = vmul.f32 10.0, %v3805_v6  ;;  %v2245_v60 = vmul.f32 10.0, %v3797_v50  ;;  %v5272_v6 = vld [vmem:[%s5257_s26] sm:$0xff] }
 0x1bf   : > { %3826 = vtanh.f32 %v1898_v23  ;;  %v3809_v53 = vpop.eup %3808  ;;  %v2244_v10 = vmul.f32 10.0, %v3807_v19  ;;  %v3027_v62 = vsel %vm3026_vm2, %v2467_v61, %v2458_v11  ;;  %v2484_v13 = vrot.slane %v5238_v16, %v5114_v7 }
 0x1c0   : > { %2008 = vadd.xlane.f32.xlu1 %v2007_v22  ;;  %v3811_v22 = vpop.eup %3810  ;;  %v2476_v50 = vsel %vm2457_vm1, %v2475_v40, %v2471_v28  ;;  %v2493_v15 = vrot.slane %v2183_v18, %v5114_v7  ;;  %v2489_v51 = vrot.slane %v2182_v41, %v5105_v56  ;;  %v2772_v11 = vrot.slane %v2245_v60, %v5114_v7 }
 0x1c1   : > { %2005 = vadd.xlane.f32.xlu0 %v5161_v58  ;;  %v1703_v5 = vpop.xlane.xlu1 %1702  ;;  %v3813_v42 = vpop.eup %3812  ;;  %v2754_v58 = vrot.slane %v5233_v24, %v5114_v7  ;;  %v2247_v24 = vmul.f32 10.0, %v3811_v22  ;;  %v2768_v0 = vrot.slane %v2244_v10, %v5105_v56  ;;  %v2185_v19 = vmul.f32 10.0, %v3809_v53 }
 0x1c2   : > { %v1700_v57 = vpop.xlane.xlu0 %1699  ;;  %3828 = vtanh.f32 %v1703_v5  ;;  %v3815_v12 = vpop.eup %3814  ;;  %v2246_v49 = vmul.f32 10.0, %v3813_v42  ;;  %v3029_v40 = vsel %vm3028_vm3, %v2476_v50, %v3027_v62  ;;  %v2016_v2 = vsel %vm531_vm0, %v5208_v4, 0.0  ;;  %v5296_v42 = vld [vmem:[%s5257_s26 + $0x20] sm:$0xff] }
 0x1c3   : > { %3830 = vtanh.f32 %v1700_v57  ;;  %v2184_v16 = vmul.f32 10.0, %v3815_v12  ;;  %v2755_v28 = vsel %vm2457_vm1, %v2754_v58, %v2750_v32  ;;  %v2019_v53 = vsel %vm531_vm0, %v5222_v3, 0.0 }
 0x1c4   : > { %1810 = vadd.xlane.f32.xlu1 %v5165_v25  ;;  %v3817_v38 = vpop.eup %3816  ;;  %v2763_v25 = vrot.slane %v2243_v63, %v5114_v7  ;;  %vm2310_vm9 = vcmp.eq.s32.totalorder %v5272_v6, 0  ;;  %v2485_v61 = vsel %vm2457_vm1, %v2484_v13, %v2480_v1  ;;  %v2494_v41 = vsel %vm2457_vm1, %v2493_v15, %v2489_v51 }
 0x1c5   : > { %1807 = vadd.xlane.f32.xlu0 %v5156_v52  ;;  %v1895_v55 = vpop.xlane.xlu1 %1894  ;;  %v3819_v44 = vpop.eup %3818  ;;  %v2189_v22 = vmul.f32 10.0, %v3817_v38  ;;  %v2777_v4 = vrot.slane %v2246_v49, %v5105_v56  ;;  %v2781_v3 = vrot.slane %v2247_v24, %v5114_v7  ;;  %v2498_v10 = vrot.slane %v2184_v16, %v5105_v56 }
 0x1c6   : > { %v1892_v23 = vpop.xlane.xlu0 %1891  ;;  %3832 = vtanh.f32 %v1895_v55  ;;  %v3821_v52 = vpop.eup %3820  ;;  %v2764_v18 = vsel %vm2457_vm1, %v2763_v25, %v2759_v21  ;;  %v2188_v57 = vmul.f32 10.0, %v3819_v44  ;;  %v2502_v60 = vrot.slane %v2185_v19, %v5114_v7 }
 0x1c7   : > { %3834 = vtanh.f32 %v1892_v23  ;;  %v3823_v59 = vpop.eup %3822  ;;  %v3031_v12 = vsel %vm3030_vm4, %v2485_v61, %v3029_v40  ;;  %v2249_v50 = vmul.f32 10.0, %v3821_v52  ;;  %v2520_v15 = vrot.slane %v2189_v22, %v5114_v7 }
 0x1c8   : > { %2002 = vadd.xlane.f32.xlu1 %v5180_v36  ;;  %v3825_v63 = vpop.eup %3824  ;;  %v3061_v36 = vsel %vm3026_vm2, %v2755_v28, %v2746_v26  ;;  %v2773_v26 = vsel %vm2457_vm1, %v2772_v11, %v2768_v0  ;;  %v2248_v13 = vmul.f32 10.0, %v3823_v59  ;;  %v3033_v21 = vsel %vm3032_vm5, %v2494_v41, %v3031_v12 }
 0x1c9   : > { %1999 = vadd.xlane.f32.xlu0 %v5172_v33  ;;  %v5280_v5 = vpop.xlane.xlu1 %1720  ;;  %v3827_v33 = vpop.eup %3826  ;;  %v3062_v1 = vsel %vm3028_vm3, %v2764_v18, %v3061_v36  ;;  %v2516_v25 = vrot.slane %v2188_v57, %v5105_v56  ;;  %vm2314_vm11 = vcmp.eq.s32.totalorder %v5296_v42, 0  ;;  %v2782_v44 = vsel %vm2457_vm1, %v2781_v3, %v2777_v4 }
 0x1ca   : > { %v5289_v32 = vpop.xlane.xlu0 %1717  ;;  %v2252_v51 = vmul.f32 10.0, %v3827_v33  ;;  %v2253_v49 = vmul.f32 10.0, %v3825_v63  ;;  %v2503_v52 = vsel %vm2457_vm1, %v2502_v60, %v2498_v10  ;;  %v3063_v0 = vsel %vm3030_vm4, %v2773_v26, %v3062_v1 }
 0x1cb   : > { %v1651_v16 = vmul.f32 %v4844_v27, %v5074_v39  ;;  %v2786_v59 = vrot.slane %v2248_v13, %v5105_v56  ;;  %v2790_v28 = vrot.slane %v2249_v50, %v5114_v7  ;;  %v3035_v40 = vsel %vm3034_vm6, %v2503_v52, %v3033_v21 }
 0x1cc   : > { %v3829_v58 = vpop.eup %3828  ;;  %1828 = vadd.xlane.f32.xlu1 %v5203_v35  ;;  %v3064_v18 = vsel %vm3032_vm5, %v2782_v44, %v3063_v0  ;;  %v2521_v57 = vsel %vm2457_vm1, %v2520_v15, %v2516_v25  ;;  %v2804_v39 = vrot.slane %v2252_v51, %v5105_v56  ;;  %v2808_v61 = vrot.slane %v2253_v49, %v5114_v7  ;;  %v5729_v44 = vld [vmem:[#allocation14_spill] sm:$0xff] }
 0x1cd   : > { %v3831_v62 = vpop.eup %3830  ;;  %v2187_v55 = vmul.f32 10.0, %v3829_v58  ;;  %1825 = vadd.xlane.f32.xlu0 %v5191_v34  ;;  %v5305_v38 = vpop.xlane.xlu1 %1912  ;;  %v1818_v58 = vsel %vm531_vm0, %v5199_v48, 0.0  ;;  %v1650_v26 = vmul.f32 %v4844_v27, %v5062_v30  ;;  %v2791_v10 = vsel %vm2457_vm1, %v2790_v28, %v2786_v59  ;;  %v5731_v28 = vld [vmem:[#allocation15_spill] sm:$0xff] }
 0x1ce   : > { %v2186_v23 = vmul.f32 10.0, %v3831_v62  ;;  %v5311_v35 = vpop.xlane.xlu0 %1909  ;;  %3836 = vtanh.f32 %v5176_v45  ;;  %v4051_v62 = vld [vmem:[%s5695_s1] sm:$0xff]  ;;  %v3065_v30 = vsel %vm3034_vm6, %v2791_v10, %v3064_v18  ;;  %v4052_v45 = vld [vmem:[%s5695_s1 + $0x8] sm:$0xff]  ;;  %v2809_v13 = vsel %vm2457_vm1, %v2808_v61, %v2804_v39  ;;  %v5732_v18 = vld [vmem:[#allocation17_spill] sm:$0xff] }
 0x1cf   : > { %v2511_v24 = vrot.slane %v2187_v55, %v5114_v7  ;;  %v1333_v48 = vadd.f32 %v4051_v62, %v4760_v31  ;;  %3838 = vtanh.f32 %v5195_v43  ;;  %v1334_v1 = vadd.f32 %v4052_v45, %v4768_v8 }
 0x1d0   : > { %v3833_v34 = vpop.eup %3832  ;;  %v2507_v11 = vrot.slane %v2186_v23, %v5105_v56  ;;  %2020 = vadd.xlane.f32.xlu1 %v2019_v53  ;;  %v2013_v50 = vsel %vm531_vm0, %v1651_v16, 0.0  ;;  %v1593_v55 = vmul.f32 %v4844_v27, %v5090_v29  ;;  %v2010_v43 = vsel %vm531_vm0, %v1650_v26, 0.0 }
 0x1d1   : > { %v3835_v19 = vpop.eup %3834  ;;  %v2251_v63 = vmul.f32 10.0, %v3833_v34  ;;  %2017 = vadd.xlane.f32.xlu0 %v2016_v2  ;;  %v5323_v36 = vpop.xlane.xlu1 %1714  ;;  %v1592_v25 = vmul.f32 %v4844_v27, %v5079_v54  ;;  %3840 = vtanh.f32 %v1334_v1  ;;  %v1332_v29 = vadd.f32 %v4052_v45, %v4774_v20  ;;  %v5392_v27 = vld [vmem:[%s5697_s3] ss:$0 sm:$0xff] }
 0x1d2   : > { %v2512_v53 = vsel %vm2457_vm1, %v2511_v24, %v2507_v11  ;;  %v2250_v22 = vmul.f32 10.0, %v3835_v19  ;;  %v5328_v33 = vpop.xlane.xlu0 %1711  ;;  %3842 = vtanh.f32 %v1333_v48  ;;  %v1331_v51 = vadd.f32 %v4051_v62, %v5729_v44  ;;  %v5730_v11 = vld [vmem:[#allocation16_spill] sm:$0xff] }
 0x1d3   : > { %v3037_v2 = vsel %vm3036_vm7, %v2512_v53, %v3035_v40  ;;  %v2799_v41 = vrot.slane %v2251_v63, %v5114_v7  ;;  %v1839_v49 = vsel %vm531_vm0, %v1593_v55, 0.0  ;;  %v1657_v54 = vmul.f32 %v5392_v27, %v5112_v14 }
 0x1d4   : > { %v3039_v4 = vsel %vm3038_vm8, %v2521_v57, %v3037_v2  ;;  %v2795_v3 = vrot.slane %v2250_v22, %v5105_v56  ;;  %1822 = vadd.xlane.f32.xlu1 %v5212_v9  ;;  %v1836_v42 = vsel %vm531_vm0, %v1592_v25, 0.0  ;;  %v1656_v24 = vmul.f32 %v5392_v27, %v5103_v47 }
 0x1d5   : > { %v3097_v60 = vsel %vm2310_vm9, -inf, %v3039_v4  ;;  %1819 = vadd.xlane.f32.xlu0 %v1818_v58  ;;  %v5352_v12 = vpop.xlane.xlu1 %1906  ;;  %3844 = vtanh.f32 %v1332_v29  ;;  %v1396_v52 = vadd.f32 %v4052_v45, %v4782_v46  ;;  %v1395_v16 = vadd.f32 %v4051_v62, %v5730_v11 }
 0x1d6   : > { %3106 = vst.msk [vmem:[%s5337_s29] sm:$0xff] %vm3105_vm10, %v3097_v60  ;;  %v2800_v9 = vsel %vm2457_vm1, %v2799_v41, %v2795_v3  ;;  %v5363_v6 = vpop.xlane.xlu0 %1903  ;;  %3846 = vtanh.f32 %v1331_v51  ;;  %v2031_v14 = vsel %vm531_vm0, %v1657_v54, 0.0  ;;  %v1591_v19 = vmul.f32 %v5392_v27, %v5096_v17 }
 0x1d7   : > { %v3066_v31 = vsel %vm3036_vm7, %v2800_v9, %v3065_v30  ;;  %v1397_v47 = vadd.f32 %v4051_v62, %v5731_v28  ;;  %v2028_v40 = vsel %vm531_vm0, %v1656_v24, 0.0  ;;  %v1590_v63 = vmul.f32 %v5392_v27, %v5084_v37 }
 0x1d8   : > { %v3067_v21 = vsel %vm3038_vm8, %v2809_v13, %v3066_v31  ;;  %2014 = vadd.xlane.f32.xlu1 %v2013_v50  ;;  %v3837_v0 = vpop.eup %3836  ;;  %v1398_v46 = vadd.f32 %v4052_v45, %v5732_v18  ;;  %3848 = vtanh.f32 %v1396_v52  ;;  %v1833_v22 = vsel %vm531_vm0, %v1591_v19, 0.0 }
 0x1d9   : > { %v3101_v8 = vsel %vm2314_vm11, -inf, %v3067_v21  ;;  %2011 = vadd.xlane.f32.xlu0 %v2010_v43  ;;  %v5380_v15 = vpop.xlane.xlu1 %1732  ;;  %v3839_v59 = vpop.eup %3838  ;;  %3850 = vtanh.f32 %v1395_v16  ;;  %v1830_v61 = vsel %vm531_vm0, %v1590_v63, 0.0  ;;  %v1654_v2 = vmul.f32 %v5392_v27, %v3837_v0 }
 0x1da   : > { %3110 = vst.msk [vmem:[%s5337_s29 + $0x20] sm:$0xff] %vm3105_vm10, %v3101_v8  ;;  %v5384_v23 = vpop.xlane.xlu0 %1729  ;;  %v1655_v17 = vmul.f32 %v5392_v27, %v3839_v59  ;;  %3852 = vtanh.f32 %v1397_v47 }
 0x1db   : > { %v3841_v39 = vpop.eup %3840  ;;  %3854 = vtanh.f32 %v1398_v46  ;;  %v2022_v10 = vsel %vm531_vm0, %v1654_v2, 0.0 }
 0x1dc   : > { %1840 = vadd.xlane.f32.xlu1 %v1839_v49  ;;  %v3843_v41 = vpop.eup %3842  ;;  %3856 = vtanh.f32 %v5280_v5  ;;  %v2025_v3 = vsel %vm531_vm0, %v1655_v17, 0.0  ;;  %v1597_v58 = vmul.f32 %v5392_v27, %v3841_v39 }
 0x1dd   : > { %1837 = vadd.xlane.f32.xlu0 %v1836_v42  ;;  %v5399_v20 = vpop.xlane.xlu1 %1924  ;;  %3858 = vtanh.f32 %v5289_v32  ;;  %v1596_v60 = vmul.f32 %v5392_v27, %v3843_v41 }
 0x1de   : > { %v5401_v34 = vpop.xlane.xlu0 %1921  ;;  %3860 = vtanh.f32 %v5305_v38  ;;  %v1851_v48 = vsel %vm531_vm0, %v1597_v58, 0.0 }
 0x1df   : > { %v3845_v26 = vpop.eup %3844  ;;  %3862 = vtanh.f32 %v5323_v36  ;;  %v1848_v9 = vsel %vm531_vm0, %v1596_v60, 0.0 }
 0x1e0   : > { %2032 = vadd.xlane.f32.xlu1 %v2031_v14  ;;  %v3847_v62 = vpop.eup %3846  ;;  %3864 = vtanh.f32 %v5328_v33  ;;  %v1595_v38 = vmul.f32 %v5392_v27, %v3845_v26 }
 0x1e1   : > { %2029 = vadd.xlane.f32.xlu0 %v2028_v40  ;;  %v1727_v57 = vpop.xlane.xlu1 %1726  ;;  %3866 = vtanh.f32 %v5311_v35  ;;  %v1594_v36 = vmul.f32 %v5392_v27, %v3847_v62 }
 0x1e2   : > { %v1724_v53 = vpop.xlane.xlu0 %1723  ;;  %v3849_v30 = vpop.eup %3848  ;;  %3868 = vtanh.f32 %v5352_v12  ;;  %v1845_v12 = vsel %vm531_vm0, %v1595_v38, 0.0 }
 0x1e3   : > { %v3851_v45 = vpop.eup %3850  ;;  %3870 = vtanh.f32 %v5363_v6  ;;  %v1659_v31 = vmul.f32 %v5392_v27, %v3849_v30  ;;  %v1842_v55 = vsel %vm531_vm0, %v1594_v36, 0.0 }
 0x1e4   : > { %1834 = vadd.xlane.f32.xlu1 %v1833_v22  ;;  %v3853_v1 = vpop.eup %3852  ;;  %3872 = vtanh.f32 %v5380_v15  ;;  %v1658_v6 = vmul.f32 %v5392_v27, %v3851_v45 }
 0x1e5   : > { %1831 = vadd.xlane.f32.xlu0 %v1830_v61  ;;  %v1919_v37 = vpop.xlane.xlu1 %1918  ;;  %v3855_v13 = vpop.eup %3854  ;;  %3874 = vtanh.f32 %v1727_v57  ;;  %v2037_v29 = vsel %vm531_vm0, %v1659_v31, 0.0  ;;  %v1660_v54 = vmul.f32 %v5392_v27, %v3853_v1 }
 0x1e6   : > { %v1916_v4 = vpop.xlane.xlu0 %1915  ;;  %v3857_v50 = vpop.eup %3856  ;;  %3876 = vtanh.f32 %v1724_v53  ;;  %v1661_v44 = vmul.f32 %v5392_v27, %v3855_v13  ;;  %v2034_v49 = vsel %vm531_vm0, %v1658_v6, 0.0 }
 0x1e7   : > { %v3859_v21 = vpop.eup %3858  ;;  %3878 = vtanh.f32 %v5384_v23  ;;  %v2040_v19 = vsel %vm531_vm0, %v1660_v54, 0.0  ;;  %v2193_v40 = vmul.f32 10.0, %v3857_v50 }
 0x1e8   : > { %2026 = vadd.xlane.f32.xlu1 %v2025_v3  ;;  %v3861_v25 = vpop.eup %3860  ;;  %3880 = vtanh.f32 %v5399_v20  ;;  %v2043_v16 = vsel %vm531_vm0, %v1661_v44, 0.0  ;;  %v2192_v47 = vmul.f32 10.0, %v3859_v21 }
 0x1e9   : > { %2023 = vadd.xlane.f32.xlu0 %v2022_v10  ;;  %v1745_v5 = vpop.xlane.xlu1 %1744  ;;  %v3863_v15 = vpop.eup %3862  ;;  %3882 = vtanh.f32 %v1919_v37  ;;  %v2257_v10 = vmul.f32 10.0, %v3861_v25 }
 0x1ea   : > { %v5426_v32 = vpop.xlane.xlu0 %1741  ;;  %v3865_v51 = vpop.eup %3864  ;;  %3884 = vtanh.f32 %v1916_v4  ;;  %v2191_v11 = vmul.f32 10.0, %v3863_v15  ;;  %v2534_v37 = vrot.slane %v2192_v47, %v5105_v56  ;;  %v2538_v4 = vrot.slane %v2193_v40, %v5114_v7 }
 0x1eb   : > { %v3867_v23 = vpop.eup %3866  ;;  %v2190_v0 = vmul.f32 10.0, %v3865_v51 }
 0x1ec   : > { %1852 = vadd.xlane.f32.xlu1 %v1851_v48  ;;  %v3869_v24 = vpop.eup %3868  ;;  %v2256_v26 = vmul.f32 10.0, %v3867_v23  ;;  %v2539_v50 = vsel %vm2457_vm1, %v2538_v4, %v2534_v37 }
 0x1ed   : > { %1849 = vadd.xlane.f32.xlu0 %v1848_v9  ;;  %v5435_v33 = vpop.xlane.xlu1 %1936  ;;  %v3871_v52 = vpop.eup %3870  ;;  %v2525_v46 = vrot.slane %v2190_v0, %v5105_v56  ;;  %v2255_v22 = vmul.f32 10.0, %v3869_v24 }
 0x1ee   : > { %v5438_v35 = vpop.xlane.xlu0 %1933  ;;  %v3873_v14 = vpop.eup %3872  ;;  %v2254_v53 = vmul.f32 10.0, %v3871_v52 }
 0x1ef   : > { %v3875_v27 = vpop.eup %3874  ;;  %v2197_v48 = vmul.f32 10.0, %v3873_v14 }
 0x1f0   : > { %1846 = vadd.xlane.f32.xlu1 %v1845_v12  ;;  %v3877_v28 = vpop.eup %3876  ;;  %v2195_v61 = vmul.f32 10.0, %v3875_v27 }
 0x1f1   : > { %1843 = vadd.xlane.f32.xlu0 %v1842_v55  ;;  %v1739_v43 = vpop.xlane.xlu1 %1738  ;;  %v3879_v18 = vpop.eup %3878  ;;  %v2194_v39 = vmul.f32 10.0, %v3877_v28  ;;  %v2826_v55 = vrot.slane %v2257_v10, %v5114_v7 }
 0x1f2   : > { %v1736_v8 = vpop.xlane.xlu0 %1735  ;;  %3886 = vtanh.f32 %v1739_v43  ;;  %v3881_v57 = vpop.eup %3880  ;;  %v2196_v30 = vmul.f32 10.0, %v3879_v18  ;;  %v2547_v36 = vrot.slane %v2195_v61, %v5114_v7  ;;  %v2822_v43 = vrot.slane %v2256_v26, %v5105_v56 }
 0x1f3   : > { %3888 = vtanh.f32 %v1736_v8  ;;  %v3883_v17 = vpop.eup %3882  ;;  %v2543_v9 = vrot.slane %v2194_v39, %v5105_v56  ;;  %v2261_v15 = vmul.f32 10.0, %v3881_v57 }
 0x1f4   : > { %2038 = vadd.xlane.f32.xlu1 %v2037_v29  ;;  %3890 = vtanh.f32 %v5401_v34  ;;  %v2529_v34 = vrot.slane %v2191_v11, %v5114_v7  ;;  %v3885_v41 = vpop.eup %3884  ;;  %v2259_v13 = vmul.f32 10.0, %v3883_v17  ;;  %v2552_v51 = vrot.slane %v2196_v30, %v5105_v56  ;;  %v2303_v30 = vld [vmem:[%s5257_s26 + $0x8] sm:$0xff] }
 0x1f5   : > { %2035 = vadd.xlane.f32.xlu0 %v2034_v49  ;;  %v1931_v42 = vpop.xlane.xlu1 %1930  ;;  %3892 = vtanh.f32 %v1745_v5  ;;  %v2813_v5 = vrot.slane %v2254_v53, %v5105_v56  ;;  %v2258_v1 = vmul.f32 10.0, %v3885_v41  ;;  %v2556_v49 = vrot.slane %v2197_v48, %v5114_v7 }
 0x1f6   : > { %v1928_v20 = vpop.xlane.xlu0 %1927  ;;  %3894 = vtanh.f32 %v1931_v42  ;;  %v2530_v60 = vsel %vm2457_vm1, %v2529_v34, %v2525_v46  ;;  %v2548_v54 = vsel %vm2457_vm1, %v2547_v36, %v2543_v9  ;;  %v2844_v28 = vrot.slane %v2261_v15, %v5114_v7 }
 0x1f7   : > { %3896 = vtanh.f32 %v1928_v20  ;;  %v3040_v25 = vsel %vm3026_vm2, %v2539_v50, %v2530_v60  ;;  %v2831_v24 = vrot.slane %v2258_v1, %v5105_v56  ;;  %v2835_v20 = vrot.slane %v2259_v13, %v5114_v7 }
 0x1f8   : > { %2044 = vadd.xlane.f32.xlu1 %v2043_v16  ;;  %3898 = vtanh.f32 %v5426_v32  ;;  %v2817_v32 = vrot.slane %v2255_v22, %v5114_v7  ;;  %v2827_v18 = vsel %vm2457_vm1, %v2826_v55, %v2822_v43  ;;  %v3041_v46 = vsel %vm3028_vm3, %v2548_v54, %v3040_v25 }
 0x1f9   : > { %2041 = vadd.xlane.f32.xlu0 %v2040_v19  ;;  %v1757_v59 = vpop.xlane.xlu1 %1756  ;;  %v2836_v22 = vsel %vm2457_vm1, %v2835_v20, %v2831_v24  ;;  %v2557_v41 = vsel %vm2457_vm1, %v2556_v49, %v2552_v51  ;;  %vm2311_vm12 = vcmp.eq.s32.totalorder %v2303_v30, 0 }
 0x1fa   : > { %v1754_v63 = vpop.xlane.xlu0 %1753  ;;  %3900 = vtanh.f32 %v1757_v59  ;;  %v2818_v44 = vsel %vm2457_vm1, %v2817_v32, %v2813_v5 }
 0x1fb   : > { %3902 = vtanh.f32 %v1754_v63  ;;  %v3068_v53 = vsel %vm3026_vm2, %v2827_v18, %v2818_v44 }
 0x1fc   : > { %3904 = vtanh.f32 %v5435_v33  ;;  %v3887_v58 = vpop.eup %3886  ;;  %v3069_v32 = vsel %vm3028_vm3, %v2836_v22, %v3068_v53 }
 0x1fd   : > { %v1949_v2 = vpop.xlane.xlu1 %1948  ;;  %3906 = vtanh.f32 %v5438_v35  ;;  %v3889_v62 = vpop.eup %3888  ;;  %v2199_v12 = vmul.f32 10.0, %v3887_v58 }
 0x1fe   : > { %v1946_v3 = vpop.xlane.xlu0 %1945  ;;  %3908 = vtanh.f32 %v1949_v2  ;;  %v3891_v38 = vpop.eup %3890  ;;  %v2198_v6 = vmul.f32 10.0, %v3889_v62  ;;  %v3042_v62 = vsel %vm3030_vm4, %v2557_v41, %v3041_v46 }
 0x1ff   : > { %3910 = vtanh.f32 %v1946_v3  ;;  %v3893_v33 = vpop.eup %3892  ;;  %v2260_v8 = vmul.f32 10.0, %v3891_v38  ;;  %v2565_v52 = vrot.slane %v2199_v12, %v5114_v7 }
 0x200   : > { %v3895_v31 = vpop.eup %3894  ;;  %v2561_v16 = vrot.slane %v2198_v6, %v5105_v56  ;;  %v2201_v40 = vmul.f32 10.0, %v3893_v33 }
 0x201   : > { %v1751_v45 = vpop.xlane.xlu1 %1750  ;;  %v3897_v21 = vpop.eup %3896  ;;  %v2263_v19 = vmul.f32 10.0, %v3895_v31  ;;  %v2840_v59 = vrot.slane %v2260_v8, %v5105_v56 }
 0x202   : > { %v1748_v35 = vpop.xlane.xlu0 %1747  ;;  %3912 = vtanh.f32 %v1751_v45  ;;  %v3899_v29 = vpop.eup %3898  ;;  %v2262_v14 = vmul.f32 10.0, %v3897_v21  ;;  %v2566_v37 = vsel %vm2457_vm1, %v2565_v52, %v2561_v16  ;;  %v2574_v60 = vrot.slane %v2201_v40, %v5114_v7  ;;  %v2307_v16 = vld [vmem:[%s5257_s26 + $0x28] sm:$0xff] }
 0x203   : > { %3914 = vtanh.f32 %v1748_v35  ;;  %v2200_v47 = vmul.f32 10.0, %v3899_v29  ;;  %v2853_v3 = vrot.slane %v2263_v19, %v5114_v7  ;;  %v2845_v26 = vsel %vm2457_vm1, %v2844_v28, %v2840_v59 }
 0x204   : > { %v3901_v42 = vpop.eup %3900  ;;  %v2849_v4 = vrot.slane %v2262_v14, %v5105_v56  ;;  %v3043_v45 = vsel %vm3032_vm5, %v2566_v37, %v3042_v62  ;;  %v3070_v43 = vsel %vm3030_vm4, %v2845_v26, %v3069_v32  ;;  %vm2315_vm13 = vcmp.eq.s32.totalorder %v2307_v16, 0 }
 0x205   : > { %v1943_v23 = vpop.xlane.xlu1 %1942  ;;  %v3903_v11 = vpop.eup %3902  ;;  %v2205_v39 = vmul.f32 10.0, %v3901_v42  ;;  %v2570_v10 = vrot.slane %v2200_v47, %v5105_v56 }
 0x206   : > { %v1940_v0 = vpop.xlane.xlu0 %1939  ;;  %3916 = vtanh.f32 %v1943_v23  ;;  %v3905_v27 = vpop.eup %3904  ;;  %v2204_v17 = vmul.f32 10.0, %v3903_v11  ;;  %v2854_v35 = vsel %vm2457_vm1, %v2853_v3, %v2849_v4 }
 0x207   : > { %3918 = vtanh.f32 %v1940_v0  ;;  %v3907_v63 = vpop.eup %3906  ;;  %v2265_v38 = vmul.f32 10.0, %v3905_v27  ;;  %v2592_v1 = vrot.slane %v2205_v39, %v5114_v7  ;;  %v2575_v21 = vsel %vm2457_vm1, %v2574_v60, %v2570_v10 }
 0x208   : > { %v3909_v57 = vpop.eup %3908  ;;  %v2264_v48 = vmul.f32 10.0, %v3907_v63  ;;  %v2588_v33 = vrot.slane %v2204_v17, %v5105_v56  ;;  %v3044_v44 = vsel %vm3034_vm6, %v2575_v21, %v3043_v45  ;;  %v3071_v54 = vsel %vm3032_vm5, %v2854_v35, %v3070_v43 }
 0x209   : > { %v5481_v34 = vpop.xlane.xlu1 %1768  ;;  %v3911_v2 = vpop.eup %3910  ;;  %v2269_v50 = vmul.f32 10.0, %v3909_v57  ;;  %v2862_v29 = vrot.slane %v2265_v38, %v5114_v7 }
 0x20a   : > { %v5485_v61 = vpop.xlane.xlu0 %1765  ;;  %v2268_v31 = vmul.f32 10.0, %v3911_v2  ;;  %v2858_v15 = vrot.slane %v2264_v48, %v5105_v56  ;;  %v2593_v23 = vsel %vm2457_vm1, %v2592_v1, %v2588_v33  ;;  %3920 = vtanh.f32 %v5481_v34 }
 0x20b   : > { %v2880_v0 = vrot.slane %v2269_v50, %v5114_v7  ;;  %3922 = vtanh.f32 %v5485_v61 }
 0x20c   : > { %v3913_v58 = vpop.eup %3912  ;;  %v2876_v52 = vrot.slane %v2268_v31, %v5105_v56  ;;  %v2863_v59 = vsel %vm2457_vm1, %v2862_v29, %v2858_v15 }
 0x20d   : > { %v3915_v5 = vpop.eup %3914  ;;  %v2203_v9 = vmul.f32 10.0, %v3913_v58  ;;  %v1961_v36 = vpop.xlane.xlu1 %1960  ;;  %v3072_v40 = vsel %vm3034_vm6, %v2863_v59, %v3071_v54 }
 0x20e   : > { %v2202_v13 = vmul.f32 10.0, %v3915_v5  ;;  %v1958_v12 = vpop.xlane.xlu0 %1957  ;;  %v2881_v46 = vsel %vm2457_vm1, %v2880_v0, %v2876_v52  ;;  %3924 = vtanh.f32 %v1961_v36 }
 0x20f   : > { %v2583_v55 = vrot.slane %v2203_v9, %v5114_v7 }
 0x210   : > { %v3917_v6 = vpop.eup %3916  ;;  %v2579_v25 = vrot.slane %v2202_v13, %v5105_v56 }
 0x211   : > { %v3919_v8 = vpop.eup %3918  ;;  %v2267_v51 = vmul.f32 10.0, %v3917_v6  ;;  %v1763_v49 = vpop.xlane.xlu1 %1762 }
 0x212   : > { %v2584_v42 = vsel %vm2457_vm1, %v2583_v55, %v2579_v25  ;;  %v2266_v24 = vmul.f32 10.0, %v3919_v8  ;;  %v1760_v20 = vpop.xlane.xlu0 %1759  ;;  %3926 = vtanh.f32 %v1763_v49 }
 0x213   : > { %v3045_v11 = vsel %vm3036_vm7, %v2584_v42, %v3044_v44  ;;  %v2871_v14 = vrot.slane %v2267_v51, %v5114_v7  ;;  %3928 = vtanh.f32 %v1760_v20 }
 0x214   : > { %v3046_v19 = vsel %vm3038_vm8, %v2593_v23, %v3045_v11  ;;  %v2867_v27 = vrot.slane %v2266_v24, %v5105_v56  ;;  %3930 = vtanh.f32 %v1958_v12  ;;  %v3921_v5 = vpop.eup %3920 }
 0x215   : > { %v3098_v28 = vsel %vm2311_vm12, -inf, %v3046_v19  ;;  %v1955_v47 = vpop.xlane.xlu1 %1954  ;;  %v3923_v32 = vpop.eup %3922  ;;  %v2209_v21 = vmul.f32 10.0, %v3921_v5 }
 0x216   : > { %3107 = vst.msk [vmem:[%s5337_s29 + $0x8] sm:$0xff] %vm3105_vm10, %v3098_v28  ;;  %v2872_v63 = vsel %vm2457_vm1, %v2871_v14, %v2867_v27  ;;  %v1952_v18 = vpop.xlane.xlu0 %1951  ;;  %3932 = vtanh.f32 %v1955_v47  ;;  %v2208_v6 = vmul.f32 10.0, %v3923_v32 }
 0x217   : > { %v3073_v57 = vsel %vm3036_vm7, %v2872_v63, %v3072_v40  ;;  %3934 = vtanh.f32 %v1952_v18  ;;  %v2610_v52 = vrot.slane %v2209_v21, %v5114_v7 }
 0x218   : > { %v3074_v53 = vsel %vm3038_vm8, %v2881_v46, %v3073_v57  ;;  %v3925_v48 = vpop.eup %3924  ;;  %v2606_v20 = vrot.slane %v2208_v6, %v5105_v56 }
 0x219   : > { %v3102_v22 = vsel %vm2315_vm13, -inf, %v3074_v53  ;;  %v1781_v17 = vpop.xlane.xlu1 %1780  ;;  %v2273_v14 = vmul.f32 10.0, %v3925_v48 }
 0x21a   : > { %3111 = vst.msk [vmem:[%s5337_s29 + $0x28] sm:$0xff] %vm3105_vm10, %v3102_v22  ;;  %v1778_v39 = vpop.xlane.xlu0 %1777  ;;  %3936 = vtanh.f32 %v1781_v17 }
 0x21c   : > { %v3927_v38 = vpop.eup %3926 }
 0x21d   : > { %v1973_v2 = vpop.xlane.xlu1 %1972  ;;  %v3929_v30 = vpop.eup %3928  ;;  %v2207_v12 = vmul.f32 10.0, %v3927_v38 }
 0x21e   : > { %v1970_v41 = vpop.xlane.xlu0 %1969  ;;  %v3931_v9 = vpop.eup %3930  ;;  %v2206_v13 = vmul.f32 10.0, %v3929_v30 }
 0x21f   : > { %v2601_v15 = vrot.slane %v2207_v12, %v5114_v7  ;;  %v2272_v16 = vmul.f32 10.0, %v3931_v9 }
 0x220   : > { %v3933_v45 = vpop.eup %3932  ;;  %v2597_v8 = vrot.slane %v2206_v13, %v5105_v56 }
 0x221   : > { %v1775_v37 = vpop.xlane.xlu1 %1774  ;;  %v3935_v1 = vpop.eup %3934  ;;  %v2271_v51 = vmul.f32 10.0, %v3933_v45 }
 0x222   : > { %v1772_v4 = vpop.xlane.xlu0 %1771  ;;  %3938 = vtanh.f32 %v1775_v37  ;;  %v2270_v44 = vmul.f32 10.0, %v3935_v1  ;;  %v2602_v19 = vsel %vm2457_vm1, %v2601_v15, %v2597_v8  ;;  %v2611_v37 = vsel %vm2457_vm1, %v2610_v52, %v2606_v20 }
 0x223   : > { %3940 = vtanh.f32 %v1772_v4  ;;  %v2889_v28 = vrot.slane %v2271_v51, %v5114_v7  ;;  %v2898_v4 = vrot.slane %v2273_v14, %v5114_v7 }
 0x224   : > { %3942 = vtanh.f32 %v1778_v39  ;;  %v3937_v35 = vpop.eup %3936  ;;  %v2885_v59 = vrot.slane %v2270_v44, %v5105_v56 }
 0x225   : > { %v1967_v3 = vpop.xlane.xlu1 %1966  ;;  %3944 = vtanh.f32 %v1973_v2  ;;  %v2213_v47 = vmul.f32 10.0, %v3937_v35 }
 0x226   : > { %v1964_v58 = vpop.xlane.xlu0 %1963  ;;  %3946 = vtanh.f32 %v1967_v3  ;;  %v2890_v32 = vsel %vm2457_vm1, %v2889_v28, %v2885_v59 }
 0x227   : > { %3948 = vtanh.f32 %v1964_v58  ;;  %v2628_v48 = vrot.slane %v2213_v47, %v5114_v7 }
 0x229   : > { %v1793_v26 = vpop.xlane.xlu1 %1792 }
 0x22a   : > { %v1790_v10 = vpop.xlane.xlu0 %1789 }
 0x22c   : > { %v3939_v31 = vpop.eup %3938 }
 0x22d   : > { %v1985_v60 = vpop.xlane.xlu1 %1984  ;;  %v3941_v55 = vpop.eup %3940  ;;  %v2211_v23 = vmul.f32 10.0, %v3939_v31 }
 0x22e   : > { %v1982_v62 = vpop.xlane.xlu0 %1981  ;;  %v3943_v25 = vpop.eup %3942  ;;  %v2210_v54 = vmul.f32 10.0, %v3941_v55 }
 0x22f   : > { %v3945_v29 = vpop.eup %3944  ;;  %v2212_v63 = vmul.f32 10.0, %v3943_v25  ;;  %v2619_v46 = vrot.slane %v2211_v23, %v5114_v7 }
 0x230   : > { %v3947_v49 = vpop.eup %3946  ;;  %v2615_v18 = vrot.slane %v2210_v54, %v5105_v56 }
 0x231   : > { %v1787_v34 = vpop.xlane.xlu1 %1786  ;;  %v3949_v24 = vpop.eup %3948  ;;  %v2275_v17 = vmul.f32 10.0, %v3947_v49 }
 0x232   : > { %v1784_v61 = vpop.xlane.xlu0 %1783  ;;  %3950 = vtanh.f32 %v1787_v34  ;;  %v2274_v22 = vmul.f32 10.0, %v3949_v24  ;;  %v2624_v34 = vrot.slane %v2212_v63, %v5105_v56  ;;  %v2304_v63 = vld [vmem:[%s5257_s26 + $0x10] sm:$0xff] }
 0x233   : > { %3952 = vtanh.f32 %v1784_v61  ;;  %v2620_v61 = vsel %vm2457_vm1, %v2619_v46, %v2615_v18  ;;  %vm2312_vm14 = vcmp.eq.s32.totalorder %v2304_v63, 0 }
 0x234   : > { %3954 = vtanh.f32 %v1970_v41  ;;  %v2903_v9 = vrot.slane %v2274_v22, %v5105_v56  ;;  %v2629_v24 = vsel %vm2457_vm1, %v2628_v48, %v2624_v34 }
 0x235   : > { %v1979_v36 = vpop.xlane.xlu1 %1978  ;;  %3956 = vtanh.f32 %v1793_v26  ;;  %v2894_v26 = vrot.slane %v2272_v16, %v5105_v56 }
 0x236   : > { %v1976_v33 = vpop.xlane.xlu0 %1975  ;;  %3958 = vtanh.f32 %v1979_v36  ;;  %v2907_v36 = vrot.slane %v2275_v17, %v5114_v7 }
 0x237   : > { %3960 = vtanh.f32 %v1976_v33  ;;  %v2899_v25 = vsel %vm2457_vm1, %v2898_v4, %v2894_v26 }
 0x238   : > { %3962 = vtanh.f32 %v1790_v10  ;;  %v3047_v10 = vsel %vm3026_vm2, %v2611_v37, %v2602_v19  ;;  %v3075_v44 = vsel %vm3026_vm2, %v2899_v25, %v2890_v32  ;;  %v2908_v51 = vsel %vm2457_vm1, %v2907_v36, %v2903_v9 }
 0x239   : > { %v1805_v50 = vpop.xlane.xlu1 %1804  ;;  %v3048_v8 = vsel %vm3028_vm3, %v2620_v61, %v3047_v10  ;;  %v3076_v28 = vsel %vm3028_vm3, %v2908_v51, %v3075_v44 }
 0x23a   : > { %v1802_v43 = vpop.xlane.xlu0 %1801  ;;  %3964 = vtanh.f32 %v1805_v50 }
 0x23b   : > { %3966 = vtanh.f32 %v1802_v43 }
 0x23c   : > { %3968 = vtanh.f32 %v1985_v60  ;;  %v3951_v11 = vpop.eup %3950 }
 0x23d   : > { %v1997_v42 = vpop.xlane.xlu1 %1996  ;;  %3970 = vtanh.f32 %v1982_v62  ;;  %v3953_v27 = vpop.eup %3952  ;;  %v2215_v39 = vmul.f32 10.0, %v3951_v11  ;;  %v2277_v62 = vmul.f32 10.0, %v3945_v29 }
 0x23e   : > { %v1994_v0 = vpop.xlane.xlu0 %1993  ;;  %3972 = vtanh.f32 %v1997_v42  ;;  %v3955_v40 = vpop.eup %3954  ;;  %v2214_v3 = vmul.f32 10.0, %v3953_v27  ;;  %v3049_v27 = vsel %vm3030_vm4, %v2629_v24, %v3048_v8 }
 0x23f   : > { %3974 = vtanh.f32 %v1994_v0  ;;  %v3957_v53 = vpop.eup %3956  ;;  %v2276_v60 = vmul.f32 10.0, %v3955_v40  ;;  %v2637_v45 = vrot.slane %v2215_v39, %v5114_v7  ;;  %v2916_v55 = vrot.slane %v2277_v62, %v5114_v7 }
 0x240   : > { %v3959_v41 = vpop.eup %3958  ;;  %v2633_v13 = vrot.slane %v2214_v3, %v5105_v56  ;;  %v2217_v21 = vmul.f32 10.0, %v3957_v53 }
 0x241   : > { %v1799_v57 = vpop.xlane.xlu1 %1798  ;;  %v3961_v58 = vpop.eup %3960  ;;  %v2279_v35 = vmul.f32 10.0, %v3959_v41  ;;  %v2912_v50 = vrot.slane %v2276_v60, %v5105_v56 }
 0x242   : > { %v1796_v2 = vpop.xlane.xlu0 %1795  ;;  %3976 = vtanh.f32 %v1799_v57  ;;  %v3963_v5 = vpop.eup %3962  ;;  %v2278_v12 = vmul.f32 10.0, %v3961_v58  ;;  %v2638_v20 = vsel %vm2457_vm1, %v2637_v45, %v2633_v13  ;;  %v2646_v19 = vrot.slane %v2217_v21, %v5114_v7  ;;  %v2308_v13 = vld [vmem:[%s5257_s26 + $0x30] sm:$0xff] }
 0x243   : > { %3978 = vtanh.f32 %v1796_v2  ;;  %v2216_v6 = vmul.f32 10.0, %v3963_v5  ;;  %v2925_v0 = vrot.slane %v2279_v35, %v5114_v7  ;;  %v2917_v16 = vsel %vm2457_vm1, %v2916_v55, %v2912_v50 }
 0x244   : > { %v3965_v30 = vpop.eup %3964  ;;  %v2921_v52 = vrot.slane %v2278_v12, %v5105_v56  ;;  %v3050_v57 = vsel %vm3032_vm5, %v2638_v20, %v3049_v27  ;;  %v3077_v26 = vsel %vm3030_vm4, %v2917_v16, %v3076_v28  ;;  %vm2316_vm15 = vcmp.eq.s32.totalorder %v2308_v13, 0 }
 0x245   : > { %v1991_v38 = vpop.xlane.xlu1 %1990  ;;  %v3967_v1 = vpop.eup %3966  ;;  %v2221_v54 = vmul.f32 10.0, %v3965_v30  ;;  %v2642_v14 = vrot.slane %v2216_v6, %v5105_v56 }
 0x246   : > { %v1988_v33 = vpop.xlane.xlu0 %1987  ;;  %3980 = vtanh.f32 %v1991_v38  ;;  %v3969_v31 = vpop.eup %3968  ;;  %v2220_v49 = vmul.f32 10.0, %v3967_v1  ;;  %v2926_v2 = vsel %vm2457_vm1, %v2925_v0, %v2921_v52 }
 0x247   : > { %3982 = vtanh.f32 %v1988_v33  ;;  %v3971_v43 = vpop.eup %3970  ;;  %v2281_v40 = vmul.f32 10.0, %v3969_v31  ;;  %v2664_v22 = vrot.slane %v2221_v54, %v5114_v7  ;;  %v2647_v58 = vsel %vm2457_vm1, %v2646_v19, %v2642_v14 }
 0x248   : > { %v3973_v29 = vpop.eup %3972  ;;  %v2280_v47 = vmul.f32 10.0, %v3971_v43  ;;  %v2660_v53 = vrot.slane %v2220_v49, %v5105_v56  ;;  %v3051_v32 = vsel %vm3034_vm6, %v2647_v58, %v3050_v57  ;;  %v3078_v61 = vsel %vm3032_vm5, %v2926_v2, %v3077_v26 }
 0x249   : > { %v5556_v15 = vpop.xlane.xlu1 %1816  ;;  %v3975_v42 = vpop.eup %3974  ;;  %v2285_v37 = vmul.f32 10.0, %v3973_v29  ;;  %v2934_v5 = vrot.slane %v2281_v40, %v5114_v7 }
 0x24a   : > { %v5560_v23 = vpop.xlane.xlu0 %1813  ;;  %v2284_v41 = vmul.f32 10.0, %v3975_v42  ;;  %v2930_v62 = vrot.slane %v2280_v47, %v5105_v56  ;;  %v2665_v38 = vsel %vm2457_vm1, %v2664_v22, %v2660_v53  ;;  %3984 = vtanh.f32 %v5556_v15 }
 0x24b   : > { %v2952_v33 = vrot.slane %v2285_v37, %v5114_v7  ;;  %3986 = vtanh.f32 %v5560_v23 }
 0x24c   : > { %v3977_v11 = vpop.eup %3976  ;;  %v2948_v45 = vrot.slane %v2284_v41, %v5105_v56  ;;  %v2935_v50 = vsel %vm2457_vm1, %v2934_v5, %v2930_v62 }
 0x24d   : > { %v3979_v59 = vpop.eup %3978  ;;  %v2219_v18 = vmul.f32 10.0, %v3977_v11  ;;  %v2009_v46 = vpop.xlane.xlu1 %2008  ;;  %v3079_v21 = vsel %vm3034_vm6, %v2935_v50, %v3078_v61 }
 0x24e   : > { %v2218_v17 = vmul.f32 10.0, %v3979_v59  ;;  %v2006_v39 = vpop.xlane.xlu0 %2005  ;;  %v2953_v8 = vsel %vm2457_vm1, %v2952_v33, %v2948_v45  ;;  %3988 = vtanh.f32 %v2009_v46 }
 0x24f   : > { %v2655_v4 = vrot.slane %v2219_v18, %v5114_v7  ;;  %3990 = vtanh.f32 %v2006_v39 }
 0x250   : > { %v3981_v3 = vpop.eup %3980  ;;  %v2651_v10 = vrot.slane %v2218_v17, %v5105_v56 }
 0x251   : > { %v3983_v60 = vpop.eup %3982  ;;  %v2283_v34 = vmul.f32 10.0, %v3981_v3  ;;  %v1811_v48 = vpop.xlane.xlu1 %1810 }
 0x252   : > { %v2656_v30 = vsel %vm2457_vm1, %v2655_v4, %v2651_v10  ;;  %v2282_v9 = vmul.f32 10.0, %v3983_v60  ;;  %v1808_v36 = vpop.xlane.xlu0 %1807  ;;  %3992 = vtanh.f32 %v1811_v48 }
 0x253   : > { %v3052_v1 = vsel %vm3036_vm7, %v2656_v30, %v3051_v32  ;;  %v2943_v12 = vrot.slane %v2283_v34, %v5114_v7  ;;  %3994 = vtanh.f32 %v1808_v36 }
 0x254   : > { %v3053_v35 = vsel %vm3038_vm8, %v2665_v38, %v3052_v1  ;;  %v2939_v31 = vrot.slane %v2282_v9, %v5105_v56  ;;  %v3985_v27 = vpop.eup %3984 }
 0x255   : > { %v3099_v55 = vsel %vm2312_vm14, -inf, %v3053_v35  ;;  %v2003_v6 = vpop.xlane.xlu1 %2002  ;;  %v3987_v28 = vpop.eup %3986  ;;  %v2225_v41 = vmul.f32 10.0, %v3985_v27 }
 0x256   : > { %3108 = vst.msk [vmem:[%s5337_s29 + $0x10] sm:$0xff] %vm3105_vm10, %v3099_v55  ;;  %v2944_v43 = vsel %vm2457_vm1, %v2943_v12, %v2939_v31  ;;  %v2000_v25 = vpop.xlane.xlu0 %1999  ;;  %3996 = vtanh.f32 %v2003_v6  ;;  %v2224_v2 = vmul.f32 10.0, %v3987_v28 }
 0x257   : > { %v3080_v29 = vsel %vm3036_vm7, %v2944_v43, %v3079_v21  ;;  %v2682_v48 = vrot.slane %v2225_v41, %v5114_v7 }
 0x258   : > { %v3081_v44 = vsel %vm3038_vm8, %v2953_v8, %v3080_v29  ;;  %v3989_v15 = vpop.eup %3988  ;;  %v2678_v34 = vrot.slane %v2224_v2, %v5105_v56 }
 0x259   : > { %v3103_v51 = vsel %vm2316_vm15, -inf, %v3081_v44  ;;  %v1829_v49 = vpop.xlane.xlu1 %1828  ;;  %v3991_v23 = vpop.eup %3990  ;;  %v5608_v38 = vmul.f32 10.0, %v3989_v15  ;;  %v5629_v15 = vld [vmem:[%s5257_s26 + $0x18] sm:$0xff] }
 0x25a   : > { %3112 = vst.msk [vmem:[%s5337_s29 + $0x30] sm:$0xff] %vm3105_vm10, %v3103_v51  ;;  %v1826_v54 = vpop.xlane.xlu0 %1825  ;;  %v5612_v45 = vmul.f32 10.0, %v3991_v23  ;;  %vm2313_vm0 = vcmp.eq.s32.totalorder %v5629_v15, 0 }
 0x25c   : > { %v3993_v40 = vpop.eup %3992 }
 0x25d   : > { %v2021_v42 = vpop.xlane.xlu1 %2020  ;;  %v3995_v18 = vpop.eup %3994  ;;  %v2223_v3 = vmul.f32 10.0, %v3993_v40 }
 0x25e   : > { %v2018_v24 = vpop.xlane.xlu0 %2017  ;;  %v2222_v4 = vmul.f32 10.0, %v3995_v18 }
 0x25f   : > { %v2673_v9 = vrot.slane %v2223_v3, %v5114_v7 }
 0x260   : > { %v3997_v46 = vpop.eup %3996  ;;  %v2669_v30 = vrot.slane %v2222_v4, %v5105_v56 }
 0x261   : > { %v1823_v20 = vpop.xlane.xlu1 %1822  ;;  %v2287_v21 = vmul.f32 10.0, %v3997_v46 }
 0x262   : > { %v1820_v52 = vpop.xlane.xlu0 %1819  ;;  %3998 = vtanh.f32 %v1823_v20  ;;  %v2674_v8 = vsel %vm2457_vm1, %v2673_v9, %v2669_v30 }
 0x263   : > { %4000 = vtanh.f32 %v1820_v52  ;;  %v2961_v28 = vrot.slane %v2287_v21, %v5114_v7 }
 0x264   : > { %4002 = vtanh.f32 %v2000_v25  ;;  %v2683_v25 = vsel %vm2457_vm1, %v2682_v48, %v2678_v34 }
 0x265   : > { %v2015_v0 = vpop.xlane.xlu1 %2014  ;;  %4004 = vtanh.f32 %v1829_v49  ;;  %v2966_v49 = vrot.slane %v5612_v45, %v5105_v56  ;;  %v3054_v27 = vsel %vm3026_vm2, %v2683_v25, %v2674_v8 }
 0x266   : > { %v2012_v11 = vpop.xlane.xlu0 %2011  ;;  %4006 = vtanh.f32 %v1826_v54  ;;  %v2970_v54 = vrot.slane %v5608_v38, %v5114_v7 }
 0x267   : > { %4008 = vtanh.f32 %v2021_v42 }
 0x268   : > { %4010 = vtanh.f32 %v2018_v24 }
 0x269   : > { %v1841_v16 = vpop.xlane.xlu1 %1840 }
 0x26a   : > { %v1838_v14 = vpop.xlane.xlu0 %1837 }
 0x26c   : > { %v3999_v57 = vpop.eup %3998 }
 0x26d   : > { %v2033_v19 = vpop.xlane.xlu1 %2032  ;;  %v4001_v22 = vpop.eup %4000  ;;  %v2227_v10 = vmul.f32 10.0, %v3999_v57 }
 0x26e   : > { %v2030_v59 = vpop.xlane.xlu0 %2029  ;;  %v4003_v39 = vpop.eup %4002  ;;  %v2226_v26 = vmul.f32 10.0, %v4001_v22 }
 0x26f   : > { %v4005_v37 = vpop.eup %4004  ;;  %v2691_v1 = vrot.slane %v2227_v10, %v5114_v7  ;;  %v2286_v6 = vmul.f32 10.0, %v4003_v39 }
 0x270   : > { %v4007_v58 = vpop.eup %4006  ;;  %v2687_v33 = vrot.slane %v2226_v26, %v5105_v56  ;;  %v2229_v44 = vmul.f32 10.0, %v4005_v37 }
 0x271   : > { %v1835_v47 = vpop.xlane.xlu1 %1834  ;;  %v4009_v62 = vpop.eup %4008  ;;  %v2228_v29 = vmul.f32 10.0, %v4007_v58 }
 0x272   : > { %v1832_v63 = vpop.xlane.xlu0 %1831  ;;  %4012 = vtanh.f32 %v1835_v47  ;;  %v4011_v32 = vpop.eup %4010  ;;  %v2692_v42 = vsel %vm2457_vm1, %v2691_v1, %v2687_v33  ;;  %v2700_v40 = vrot.slane %v2229_v44, %v5114_v7  ;;  %v2293_v18 = vmul.f32 10.0, %v4009_v62 }
 0x273   : > { %4014 = vtanh.f32 %v1832_v63  ;;  %v2696_v47 = vrot.slane %v2228_v29, %v5105_v56  ;;  %v2292_v63 = vmul.f32 10.0, %v4011_v32  ;;  %v3055_v57 = vsel %vm3028_vm3, %v2692_v42, %v3054_v27 }
 0x274   : > { %4016 = vtanh.f32 %v2015_v0  ;;  %v2988_v48 = vrot.slane %v2293_v18, %v5114_v7 }
 0x275   : > { %4018 = vtanh.f32 %v2012_v11  ;;  %v2027_v53 = vpop.xlane.xlu1 %2026  ;;  %v2701_v32 = vsel %vm2457_vm1, %v2700_v40, %v2696_v47  ;;  %v2984_v34 = vrot.slane %v2292_v63, %v5105_v56 }
 0x276   : > { %4020 = vtanh.f32 %v1841_v16  ;;  %v2024_v17 = vpop.xlane.xlu0 %2023  ;;  %v3056_v9 = vsel %vm3030_vm4, %v2701_v32, %v3055_v57  ;;  %v2309_v57 = vld [vmem:[%s5257_s26 + $0x38] sm:$0xff] }
 0x277   : > { %4022 = vtanh.f32 %v1838_v14  ;;  %v2989_v44 = vsel %vm2457_vm1, %v2988_v48, %v2984_v34 }
 0x278   : > { %4024 = vtanh.f32 %v2027_v53 }
 0x279   : > { %4026 = vtanh.f32 %v2024_v17  ;;  %v1853_v60 = vpop.xlane.xlu1 %1852 }
 0x27a   : > { %v1850_v5 = vpop.xlane.xlu0 %1849  ;;  %4028 = vtanh.f32 %v1853_v60 }
 0x27b   : > { %4030 = vtanh.f32 %v1850_v5 }
 0x27c   : > { %v4013_v61 = vpop.eup %4012  ;;  %4032 = vtanh.f32 %v2033_v19 }
 0x27d   : > { %v4015_v36 = vpop.eup %4014  ;;  %4034 = vtanh.f32 %v2030_v59  ;;  %v1847_v13 = vpop.xlane.xlu1 %1846  ;;  %v2231_v31 = vmul.f32 10.0, %v4013_v61  ;;  %v2957_v59 = vrot.slane %v2286_v6, %v5105_v56  ;;  %v2971_v6 = vsel %vm2457_vm1, %v2970_v54, %v2966_v49 }
 0x27e   : > { %v4017_v12 = vpop.eup %4016  ;;  %v2230_v35 = vmul.f32 10.0, %v4015_v36  ;;  %v1844_v50 = vpop.xlane.xlu0 %1843  ;;  %4036 = vtanh.f32 %v1847_v13 }
 0x27f   : > { %v4019_v55 = vpop.eup %4018  ;;  %4038 = vtanh.f32 %v1844_v50  ;;  %v2291_v24 = vmul.f32 10.0, %v4017_v12  ;;  %v2709_v16 = vrot.slane %v2231_v31, %v5114_v7  ;;  %v2962_v5 = vsel %vm2457_vm1, %v2961_v28, %v2957_v59 }
 0x280   : > { %v4021_v43 = vpop.eup %4020  ;;  %v2290_v0 = vmul.f32 10.0, %v4019_v55  ;;  %v2705_v11 = vrot.slane %v2230_v35, %v5105_v56  ;;  %v3082_v29 = vsel %vm3026_vm2, %v2971_v6, %v2962_v5  ;;  %vm2317_vm2 = vcmp.eq.s32.totalorder %v2309_v57, 0 }
 0x281   : > { %v4023_v51 = vpop.eup %4022  ;;  %v2039_v20 = vpop.xlane.xlu1 %2038  ;;  %v2979_v53 = vrot.slane %v2291_v24, %v5114_v7  ;;  %v2233_v17 = vmul.f32 10.0, %v4021_v43 }
 0x282   : > { %v4025_v52 = vpop.eup %4024  ;;  %v2036_v14 = vpop.xlane.xlu0 %2035  ;;  %4040 = vtanh.f32 %v2039_v20  ;;  %v2232_v22 = vmul.f32 10.0, %v4023_v51  ;;  %v2975_v41 = vrot.slane %v2290_v0, %v5105_v56  ;;  %v2710_v37 = vsel %vm2457_vm1, %v2709_v16, %v2705_v11 }
 0x283   : > { %v4027_v19 = vpop.eup %4026  ;;  %4042 = vtanh.f32 %v2036_v14  ;;  %v2295_v4 = vmul.f32 10.0, %v4025_v52  ;;  %v2718_v30 = vrot.slane %v2233_v17, %v5114_v7  ;;  %v3057_v33 = vsel %vm3032_vm5, %v2710_v37, %v3056_v9 }
 0x284   : > { %v4029_v23 = vpop.eup %4028  ;;  %v2294_v26 = vmul.f32 10.0, %v4027_v19  ;;  %v2714_v38 = vrot.slane %v2232_v22, %v5105_v56  ;;  %v2980_v45 = vsel %vm2457_vm1, %v2979_v53, %v2975_v41 }
 0x285   : > { %v4031_v46 = vpop.eup %4030  ;;  %v2045_v39 = vpop.xlane.xlu1 %2044  ;;  %v2237_v60 = vmul.f32 10.0, %v4029_v23  ;;  %v2997_v1 = vrot.slane %v2295_v4, %v5114_v7  ;;  %v3083_v24 = vsel %vm3028_vm3, %v2980_v45, %v3082_v29 }
 0x286   : > { %v4033_v2 = vpop.eup %4032  ;;  %v2042_v3 = vpop.xlane.xlu0 %2041  ;;  %4044 = vtanh.f32 %v2045_v39  ;;  %v2236_v10 = vmul.f32 10.0, %v4031_v46  ;;  %v2993_v12 = vrot.slane %v2294_v26, %v5105_v56  ;;  %v2719_v51 = vsel %vm2457_vm1, %v2718_v30, %v2714_v38 }
 0x287   : > { %v4035_v58 = vpop.eup %4034  ;;  %4046 = vtanh.f32 %v2042_v3  ;;  %v2736_v31 = vrot.slane %v2237_v60, %v5114_v7  ;;  %v2297_v43 = vmul.f32 10.0, %v4033_v2  ;;  %v3058_v20 = vsel %vm3034_vm6, %v2719_v51, %v3057_v33 }
 0x288   : > { %v4037_v62 = vpop.eup %4036  ;;  %v2732_v35 = vrot.slane %v2236_v10, %v5105_v56  ;;  %v2296_v21 = vmul.f32 10.0, %v4035_v58  ;;  %v2998_v54 = vsel %vm2457_vm1, %v2997_v1, %v2993_v12  ;;  %v3084_v47 = vsel %vm3030_vm4, %v2989_v44, %v3083_v24 }
 0x289   : > { %v4039_v61 = vpop.eup %4038  ;;  %v2235_v36 = vmul.f32 10.0, %v4037_v62  ;;  %v3006_v27 = vrot.slane %v2297_v43, %v5114_v7  ;;  %v3085_v18 = vsel %vm3032_vm5, %v2998_v54, %v3084_v47 }
 0x28a   : > { %v2234_v13 = vmul.f32 10.0, %v4039_v61  ;;  %v2737_v0 = vsel %vm2457_vm1, %v2736_v31, %v2732_v35  ;;  %v3002_v19 = vrot.slane %v2296_v21, %v5105_v56 }
 0x28b   : > { %v2727_v50 = vrot.slane %v2235_v36, %v5114_v7 }
 0x28c   : > { %v4041_v55 = vpop.eup %4040  ;;  %v2723_v25 = vrot.slane %v2234_v13, %v5105_v56  ;;  %v3007_v17 = vsel %vm2457_vm1, %v3006_v27, %v3002_v19 }
 0x28d   : > { %v4043_v8 = vpop.eup %4042  ;;  %v2299_v42 = vmul.f32 10.0, %v4041_v55  ;;  %v3086_v2 = vsel %vm3034_vm6, %v3007_v17, %v3085_v18 }
 0x28e   : > { %v2728_v52 = vsel %vm2457_vm1, %v2727_v50, %v2723_v25  ;;  %v2298_v49 = vmul.f32 10.0, %v4043_v8 }
 0x28f   : > { %v3059_v11 = vsel %vm3036_vm7, %v2728_v52, %v3058_v20  ;;  %v3015_v16 = vrot.slane %v2299_v42, %v5114_v7 }
 0x290   : > { %v4045_v14 = vpop.eup %4044  ;;  %v3060_v59 = vsel %vm3038_vm8, %v2737_v0, %v3059_v11  ;;  %v3011_v28 = vrot.slane %v2298_v49, %v5105_v56 }
 0x291   : > { %v4047_v23 = vpop.eup %4046  ;;  %v3100_v40 = vsel %vm2313_vm0, -inf, %v3060_v59  ;;  %v2301_v63 = vmul.f32 10.0, %v4045_v14 }
 0x292   : > { %3109 = vst.msk [vmem:[%s5337_s29 + $0x18] sm:$0xff] %vm3105_vm10, %v3100_v40  ;;  %v2300_v46 = vmul.f32 10.0, %v4047_v23  ;;  %v3016_v53 = vsel %vm2457_vm1, %v3015_v16, %v3011_v28 }
 0x293   : > { %v3024_v22 = vrot.slane %v2301_v63, %v5114_v7  ;;  %v3087_v15 = vsel %vm3036_vm7, %v3016_v53, %v3086_v2 }
 0x294   : > { %v3020_v39 = vrot.slane %v2300_v46, %v5105_v56 }
 0x296   : > { %v3025_v41 = vsel %vm2457_vm1, %v3024_v22, %v3020_v39 }
 0x297   : > { %v3088_v37 = vsel %vm3038_vm8, %v3025_v41, %v3087_v15 }
 0x298   : > { %v3104_v4 = vsel %vm2317_vm2, -inf, %v3088_v37 }
 0x299   : > { %3113 = vst.msk [vmem:[%s5337_s29 + $0x38] sm:$0xff] %vm3105_vm10, %v3104_v4 }
 0x29a PF: > { %s15_s20 = sadd.s32 1, %s4076_s20   ;;  %s5733_s18 = smov %s4072_s19 }
 0x29b   : > { %p12_p6 = scmp.ge.s32.totalorder %s15_s20, 6   ;;  %s5734_s19 = smov %s5736_s21 }
 0x29d   :  { %14 = sbr.rel (!%p12_p6) target bundleno = 2 (0x2), region = 76 }

</bundles_post_ra>
